<compile_context>
chip_gen: v7x
topology: tpu7x:2x2x1
jax: 0.10.0
libtpu: 0.0.40
codegen_flags: <defaults>
</compile_context>

<pallas_src>
import jax
import jax.numpy as jnp
from jax.experimental import pallas as pl
from jax.experimental.pallas import tpu as pltpu

EMBED_DIM = 32
NUM_HEADS = 4
HEAD_DIM = EMBED_DIM // NUM_HEADS
SCALING = HEAD_DIM ** -0.5
ACT_CLAMP = 1e-5  # SmoothQuant-style per-token scale clamp


# --------------------------------------------------------------------------
# Kernel
# --------------------------------------------------------------------------
def _make_fused_attn_kernel(batch, seq, num_heads):
    def kernel(x_ref, wqkv_ref, sqkv_ref, bqkv_ref, wo_ref, so_ref, bo_ref,
               mask_ref, out_ref, ctx_ref):
        E = x_ref.shape[1]
        D = E // num_heads
        T = seq
        S = mask_ref.shape[2]

        # ---- fused QKV projection --------------------------------------------
        # per-token A8: int-valued activations, bf16 MXU dot (exact), scale epilogue
        x = x_ref[...]                                                  # (BT, E)
        s_a = jnp.maximum(
            jnp.max(jnp.abs(x), axis=-1, keepdims=True) / 127.0, ACT_CLAMP)  # (BT, 1)
        inv_sa = pl.reciprocal(s_a, approx=False)                       # (BT,1), off the wide VALU path
        x_int = jnp.clip(jnp.round(x * inv_sa), -127.0, 127.0)
        qkv_int = jnp.dot(x_int.astype(jnp.bfloat16), wqkv_ref[...],
                          preferred_element_type=jnp.float32)           # (BT, 3E), integer-valued
        # 1/sqrt(head_dim) is pre-folded into the q columns of sqkv/bqkv
        qkv = qkv_int * (s_a * sqkv_ref[...]) + bqkv_ref[...]

        q = qkv[:, :E]
        k = qkv[:, E:2 * E]
        v = qkv[:, 2 * E:]
        # KV cache slabs go straight into the single packed 128-lane output
        out_ref[:, E:2 * E] = k
        out_ref[:, 2 * E:3 * E] = v

        # ---- attention: unrolled over (batch, head), scores stay in vregs ------
        for b in range(batch):
            r0, r1 = b * T, (b + 1) * T
            mask_b = mask_ref[b]                                        # (T, S)
            for h in range(num_heads):
                c0, c1 = h * D, (h + 1) * D
                qh = q[r0:r1, c0:c1]                                    # (T, D)
                kh = k[r0:r1, c0:c1]                                    # (S, D)
                vh = v[r0:r1, c0:c1]                                    # (S, D)
                scores = jnp.dot(qh, kh.T,
                                 preferred_element_type=jnp.float32) + mask_b
                m = jnp.max(scores, axis=-1, keepdims=True)
                e = jnp.exp(scores - m)
                denom = jnp.sum(e, axis=-1, keepdims=True)
                probs = e * pl.reciprocal(denom, approx=True)           # EUP slot
                # write per-head results in place (no jnp.concatenate)
                ctx_ref[r0:r1, c0:c1] = jnp.dot(
                    probs, vh, preferred_element_type=jnp.float32)
                out_ref[r0:r1, 3 * E + h * S:3 * E + (h + 1) * S] = probs

        # ---- out projection (same int-values + scale-epilogue structure) ------
        ao = ctx_ref[...]                                               # (BT, E)
        s_o = jnp.maximum(
            jnp.max(jnp.abs(ao), axis=-1, keepdims=True) / 127.0, ACT_CLAMP)
        inv_so = pl.reciprocal(s_o, approx=False)
        ao_int = jnp.clip(jnp.round(ao * inv_so), -127.0, 127.0)
        o_int = jnp.dot(ao_int.astype(jnp.bfloat16), wo_ref[...],
                        preferred_element_type=jnp.float32)
        out_ref[:, :E] = o_int * (s_o * so_ref[...]) + bo_ref[...]

    return kernel


# --------------------------------------------------------------------------
# Wrapper (pallas_call glue)
# --------------------------------------------------------------------------
def quant_opt_attention_forward(params, hidden_states, attention_mask,
                                output_attentions=False):
    """Self-attention path (key_value_states=None, past_key_value=None)."""
    B, T, E = hidden_states.shape
    H = NUM_HEADS
    D = E // H
    S = attention_mask.shape[-1]
    BT = B * T
    PACK = 3 * E + H * S  # = 128 lanes at (E=32,H=4,S=8): one unmasked-vst slab

    x2 = hidden_states.reshape(BT, E)
    mask = attention_mask.reshape(B, T, S)  # squeeze the singleton head dim

    kernel = _make_fused_attn_kernel(B, T, H)

    # Probs occupy the last H*S lanes of the packed slab.  They are a free
    # by-product of the softmax, so they are always written (keeps the single
    # 128-lane store); the wrapper just drops them when not requested.
    packed = pl.pallas_call(
        kernel,
        out_shape=jax.ShapeDtypeStruct((BT, PACK), jnp.float32),
        grid=(1,),  # single step: whole batch in one slab, no per-step overhead
        in_specs=[
            pl.BlockSpec((BT, E), lambda i: (0, 0)),          # hidden_states slab
            pl.BlockSpec((E, 3 * E), lambda i: (0, 0)),       # fused QKV int weights (bf16)
            pl.BlockSpec((1, 3 * E), lambda i: (0, 0)),       # per-out-channel scales
            pl.BlockSpec((1, 3 * E), lambda i: (0, 0)),       # fused QKV bias
            pl.BlockSpec((E, E), lambda i: (0, 0)),           # out_proj int weight (bf16)
            pl.BlockSpec((1, E), lambda i: (0, 0)),           # out_proj scales
            pl.BlockSpec((1, E), lambda i: (0, 0)),           # out_proj bias
            pl.BlockSpec((B, T, S), lambda i: (0, 0, 0)),     # attention mask (squeezed)
        ],
        out_specs=pl.BlockSpec((BT, PACK), lambda i: (0, 0)),
        scratch_shapes=[pltpu.VMEM((BT, E), jnp.float32)],    # per-head context slab
        compiler_params=pltpu.CompilerParams(
            dimension_semantics=("arbitrary",)),
    )(x2, params["wqkv_int"], params["sqkv"], params["bqkv"],
      params["wo_int"], params["so"], params["bo"], mask)

    out = packed[:, :E].reshape(B, T, E)
    k_slab = packed[:, E:2 * E]
    v_slab = packed[:, 2 * E:3 * E]

    def head_shape(t):  # (BT, E) -> (B, H, T, D)
        return t.reshape(B, T, H, D).transpose(0, 2, 1, 3)

    past_key_value = (head_shape(k_slab), head_shape(v_slab))

    attn_weights = None
    if output_attentions:
        attn_weights = packed[:, 3 * E:].reshape(B, T, H, S).transpose(0, 2, 1, 3)

    return out, attn_weights, past_key_value


# --------------------------------------------------------------------------
# Parameter setup (glue, plain JAX)
# --------------------------------------------------------------------------
def _quantize_weight(w):
    """Per-output-channel symmetric int8: returns int-valued weights + scales."""
    s = jnp.maximum(jnp.max(jnp.abs(w), axis=0, keepdims=True) / 127.0, 1e-8)
    w_int = jnp.clip(jnp.round(w / s), -127.0, 127.0)
    return w_int, s


def init_params(key):
    keys = jax.random.split(key, 8)

    def w(k):
        return 0.02 * jax.random.normal(k, (EMBED_DIM, EMBED_DIM), jnp.float32)

    def b(k):
        return 0.01 * jax.random.normal(k, (EMBED_DIM,), jnp.float32)

    wq_i, sq = _quantize_weight(w(keys[0])); bq = b(keys[1])
    wk_i, sk = _quantize_weight(w(keys[2])); bk = b(keys[3])
    wv_i, sv = _quantize_weight(w(keys[4])); bv = b(keys[5])
    wo_i, so = _quantize_weight(w(keys[6])); bo = b(keys[7])

    # Fold 1/sqrt(head_dim) into q_proj's scale/bias AFTER quantization, so the
    # int8 grid is unchanged (matches reference `q_proj(x) * scaling`).
    sq = sq * SCALING
    bq = bq * SCALING

    return {
        # int values in [-127, 127] are exact in bf16
        "wqkv_int": jnp.concatenate([wq_i, wk_i, wv_i], axis=1).astype(jnp.bfloat16),
        "sqkv": jnp.concatenate([sq, sk, sv], axis=1),                     # (1, 3E) f32
        "bqkv": jnp.concatenate([bq, bk, bv], axis=0).reshape(1, 3 * EMBED_DIM),
        "wo_int": wo_i.astype(jnp.bfloat16),                               # (E, E)
        "so": so,                                                          # (1, E)
        "bo": bo.reshape(1, EMBED_DIM),                                    # (1, E)
    }


# --------------------------------------------------------------------------
# Pure-JAX reference (fp32 fake-quant formulation) for correctness check
# --------------------------------------------------------------------------
def _ref_forward(params, x, mask):
    B, T, E = x.shape
    H, D = NUM_HEADS, HEAD_DIM
    x2 = x.reshape(B * T, E)

    def aq(t):
        s = jnp.maximum(jnp.max(jnp.abs(t), axis=-1, keepdims=True) / 127.0, ACT_CLAMP)
        return jnp.clip(jnp.round(t / s), -127.0, 127.0) * s

    # reconstruct fake-quant fp32 weights (scaling already folded into sqkv/bqkv)
    wqkv = params["wqkv_int"].astype(jnp.float32) * params["sqkv"]
    wo = params["wo_int"].astype(jnp.float32) * params["so"]

    qkv = aq(x2) @ wqkv + params["bqkv"]
    q, k, v = qkv[:, :E], qkv[:, E:2 * E], qkv[:, 2 * E:]

    def sh(t):  # (B*T, E) -> (B, H, T, D)
        return t.reshape(B, T, H, D).transpose(0, 2, 1, 3)

    qh, kh, vh = sh(q), sh(k), sh(v)
    scores = jnp.einsum("bhtd,bhsd->bhts", qh, kh) + mask
    probs = jax.nn.softmax(scores, axis=-1)
    ctx = jnp.einsum("bhts,bhsd->bhtd", probs, vh)
    ao = ctx.transpose(0, 2, 1, 3).reshape(B * T, E)
    out = (aq(ao) @ wo + params["bo"]).reshape(B, T, E)
    return out, probs, kh, vh


if __name__ == "__main__":
    B, T = 2, 8
    key = jax.random.PRNGKey(0)
    kp, kx = jax.random.split(key)
    params = init_params(kp)
    hidden_states = jax.random.normal(kx, (B, T, EMBED_DIM), jnp.float32)

    # causal attention mask, shape (B, 1, T, T): 0 on allowed, -1e9 on future
    causal = jnp.triu(jnp.full((T, T), -1e9, jnp.float32), k=1)
    attention_mask = jnp.broadcast_to(causal, (B, 1, T, T))

    out, attn_w, past_kv = quant_opt_attention_forward(
        params, hidden_states, attention_mask, output_attentions=True)
    out = jax.block_until_ready(out)
    attn_w = jax.block_until_ready(attn_w)
    jax.block_until_ready(past_kv)

    out_fast, attn_none, _ = quant_opt_attention_forward(
        params, hidden_states, attention_mask, output_attentions=False)
    out_fast = jax.block_until_ready(out_fast)

    ref_out, ref_probs, ref_k, ref_v = _ref_forward(params, hidden_states, attention_mask)

    assert out.shape == (B, T, EMBED_DIM)
    assert attn_w.shape == (B, NUM_HEADS, T, T)
    assert attn_none is None
    assert past_kv[0].shape == (B, NUM_HEADS, T, HEAD_DIM)
    assert past_kv[1].shape == (B, NUM_HEADS, T, HEAD_DIM)

    # approx reciprocal in the softmax (EUP) -> slightly looser tolerance than exact div
    assert jnp.allclose(out, ref_out, atol=2e-3, rtol=2e-3)
    assert jnp.allclose(out_fast, ref_out, atol=2e-3, rtol=2e-3)
    assert jnp.allclose(attn_w, ref_probs, atol=2e-3, rtol=2e-3)
    assert jnp.allclose(past_kv[0], ref_k, atol=1e-3, rtol=1e-3)
    assert jnp.allclose(past_kv[1], ref_v, atol=1e-3, rtol=1e-3)

    print("KERNEL_OK")
</pallas_src>

<mosaic_0001>
module attributes {stable_mosaic.version = 11 : i64} {
  func.func @kernel(%arg0: i32, %arg1: memref<16x32xf32, #tpu.memory_space<vmem>>, %arg2: memref<32x96xbf16, #tpu.memory_space<vmem>>, %arg3: memref<1x96xf32, #tpu.memory_space<vmem>>, %arg4: memref<1x96xf32, #tpu.memory_space<vmem>>, %arg5: memref<32x32xbf16, #tpu.memory_space<vmem>>, %arg6: memref<1x32xf32, #tpu.memory_space<vmem>>, %arg7: memref<1x32xf32, #tpu.memory_space<vmem>>, %arg8: memref<2x8x8xf32, #tpu.memory_space<vmem>>, %arg9: memref<16x128xf32, #tpu.memory_space<vmem>>, %arg10: memref<16x32xf32, #tpu.memory_space<vmem>>) attributes {dimension_semantics = [#tpu.dimension_semantics<arbitrary>], iteration_bounds = array<i64: 1>, scalar_prefetch = 0 : i64, scratch_operands = 1 : i64, tpu.core_type = #tpu.core_type<tc>, window_params = [{pipeline_mode = #tpu.pipeline_mode<synchronous>, transform_indices = @transform_0, window_bounds = array<i64: 16, 32>}, {pipeline_mode = #tpu.pipeline_mode<synchronous>, transform_indices = @transform_1, window_bounds = array<i64: 32, 96>}, {pipeline_mode = #tpu.pipeline_mode<synchronous>, transform_indices = @transform_2, window_bounds = array<i64: 1, 96>}, {pipeline_mode = #tpu.pipeline_mode<synchronous>, transform_indices = @transform_3, window_bounds = array<i64: 1, 96>}, {pipeline_mode = #tpu.pipeline_mode<synchronous>, transform_indices = @transform_4, window_bounds = array<i64: 32, 32>}, {pipeline_mode = #tpu.pipeline_mode<synchronous>, transform_indices = @transform_5, window_bounds = array<i64: 1, 32>}, {pipeline_mode = #tpu.pipeline_mode<synchronous>, transform_indices = @transform_6, window_bounds = array<i64: 1, 32>}, {pipeline_mode = #tpu.pipeline_mode<synchronous>, transform_indices = @transform_7, window_bounds = array<i64: 2, 8, 8>}, {pipeline_mode = #tpu.pipeline_mode<synchronous>, transform_indices = @transform_8, window_bounds = array<i64: 16, 128>}]} {
    %c0 = arith.constant 0 : index
    %c0_0 = arith.constant 0 : index
    %0 = vector.load %arg1[%c0, %c0_0] : memref<16x32xf32, #tpu.memory_space<vmem>>, vector<16x32xf32>
    %1 = math.absf %0 : vector<16x32xf32>
    %cst = arith.constant dense<0xFF800000> : vector<16xf32>
    %2 = vector.multi_reduction <maximumf>, %1, %cst [1] : vector<16x32xf32> to vector<16xf32>
    %3 = vector.shape_cast %2 : vector<16xf32> to vector<16x1xf32>
    %cst_1 = arith.constant 1.270000e+02 : f32
    %4 = vector.broadcast %cst_1 : f32 to vector<16x1xf32>
    %5 = arith.divf %3, %4 : vector<16x1xf32>
    %cst_2 = arith.constant 9.99999974E-6 : f32
    %6 = vector.broadcast %cst_2 : f32 to vector<16x1xf32>
    %7 = arith.maximumf %5, %6 : vector<16x1xf32>
    %8 = tpu.reciprocal %7 : vector<16x1xf32> -> vector<16x1xf32>
    %9 = vector.broadcast %8 : vector<16x1xf32> to vector<16x32xf32>
    %10 = arith.mulf %0, %9 : vector<16x32xf32>
    %11 = math.roundeven %10 : vector<16x32xf32>
    %cst_3 = arith.constant -1.270000e+02 : f32
    %cst_4 = arith.constant 1.270000e+02 : f32
    %12 = vector.broadcast %cst_3 : f32 to vector<16x32xf32>
    %13 = arith.maximumf %12, %11 : vector<16x32xf32>
    %14 = vector.broadcast %cst_4 : f32 to vector<16x32xf32>
    %15 = arith.minimumf %14, %13 : vector<16x32xf32>
    %16 = arith.truncf %15 : vector<16x32xf32> to vector<16x32xbf16>
    %c0_5 = arith.constant 0 : index
    %c0_6 = arith.constant 0 : index
    %17 = vector.load %arg2[%c0_5, %c0_6] : memref<32x96xbf16, #tpu.memory_space<vmem>>, vector<32x96xbf16>
    %cst_7 = arith.constant dense<0.000000e+00> : vector<16x96xf32>
    %18 = tpu.matmul %16, %17, %cst_7 {dimension_numbers = #tpu.dot_dimension_numbers<[1], [0], [0], [1], [0, 0, 1, 1], [], []>} : vector<16x32xbf16>, vector<32x96xbf16>, vector<16x96xf32> -> vector<16x96xf32>
    %c0_8 = arith.constant 0 : index
    %c0_9 = arith.constant 0 : index
    %19 = vector.load %arg3[%c0_8, %c0_9] : memref<1x96xf32, #tpu.memory_space<vmem>>, vector<1x96xf32>
    %20 = vector.broadcast %7 : vector<16x1xf32> to vector<16x96xf32>
    %21 = vector.broadcast %19 : vector<1x96xf32> to vector<16x96xf32>
    %22 = arith.mulf %20, %21 : vector<16x96xf32>
    %23 = arith.mulf %18, %22 : vector<16x96xf32>
    %c0_10 = arith.constant 0 : index
    %c0_11 = arith.constant 0 : index
    %24 = vector.load %arg4[%c0_10, %c0_11] : memref<1x96xf32, #tpu.memory_space<vmem>>, vector<1x96xf32>
    %25 = vector.broadcast %24 : vector<1x96xf32> to vector<16x96xf32>
    %26 = arith.addf %23, %25 : vector<16x96xf32>
    %27 = vector.extract_strided_slice %26 {offsets = [0, 0], sizes = [16, 32], strides = [1, 1]} : vector<16x96xf32> to vector<16x32xf32>
    %28 = vector.extract_strided_slice %26 {offsets = [0, 32], sizes = [16, 32], strides = [1, 1]} : vector<16x96xf32> to vector<16x32xf32>
    %29 = vector.extract_strided_slice %26 {offsets = [0, 64], sizes = [16, 32], strides = [1, 1]} : vector<16x96xf32> to vector<16x32xf32>
    %c0_12 = arith.constant 0 : index
    %c32 = arith.constant 32 : index
    %30 = vector.load %arg9[%c0_12, %c32] : memref<16x128xf32, #tpu.memory_space<vmem>>, vector<16x32xf32>
    tpu.vector_store %arg9[%c0_12, %c32], %28 {strides = array<i32>} : memref<16x128xf32, #tpu.memory_space<vmem>>, vector<16x32xf32>,
    %c0_13 = arith.constant 0 : index
    %c64 = arith.constant 64 : index
    %31 = vector.load %arg9[%c0_13, %c64] : memref<16x128xf32, #tpu.memory_space<vmem>>, vector<16x32xf32>
    tpu.vector_store %arg9[%c0_13, %c64], %29 {strides = array<i32>} : memref<16x128xf32, #tpu.memory_space<vmem>>, vector<16x32xf32>,
    %c0_14 = arith.constant 0 : index
    %c0_15 = arith.constant 0 : index
    %c0_16 = arith.constant 0 : index
    %32 = vector.load %arg8[%c0_14, %c0_15, %c0_16] : memref<2x8x8xf32, #tpu.memory_space<vmem>>, vector<1x8x8xf32>
    %33 = vector.shape_cast %32 : vector<1x8x8xf32> to vector<8x8xf32>
    %34 = vector.extract_strided_slice %27 {offsets = [0, 0], sizes = [8, 8], strides = [1, 1]} : vector<16x32xf32> to vector<8x8xf32>
    %35 = vector.extract_strided_slice %28 {offsets = [0, 0], sizes = [8, 8], strides = [1, 1]} : vector<16x32xf32> to vector<8x8xf32>
    %36 = vector.extract_strided_slice %29 {offsets = [0, 0], sizes = [8, 8], strides = [1, 1]} : vector<16x32xf32> to vector<8x8xf32>
    %37 = tpu.transpose %35, [1, 0] : vector<8x8xf32> -> vector<8x8xf32>
    %cst_17 = arith.constant dense<0.000000e+00> : vector<8x8xf32>
    %38 = tpu.matmul %34, %37, %cst_17 {dimension_numbers = #tpu.dot_dimension_numbers<[1], [0], [0], [1], [0, 0, 1, 1], [], []>} : vector<8x8xf32>, vector<8x8xf32>, vector<8x8xf32> -> vector<8x8xf32>
    %39 = arith.addf %38, %33 : vector<8x8xf32>
    %cst_18 = arith.constant dense<0xFF800000> : vector<8xf32>
    %40 = vector.multi_reduction <maximumf>, %39, %cst_18 [1] : vector<8x8xf32> to vector<8xf32>
    %41 = vector.shape_cast %40 : vector<8xf32> to vector<8x1xf32>
    %42 = vector.broadcast %41 : vector<8x1xf32> to vector<8x8xf32>
    %43 = arith.subf %39, %42 : vector<8x8xf32>
    %44 = math.exp %43 : vector<8x8xf32>
    %cst_19 = arith.constant dense<0.000000e+00> : vector<8xf32>
    %45 = vector.multi_reduction <add>, %44, %cst_19 [1] : vector<8x8xf32> to vector<8xf32>
    %46 = vector.shape_cast %45 : vector<8xf32> to vector<8x1xf32>
    %47 = tpu.reciprocal %46 {approx = true} : vector<8x1xf32> -> vector<8x1xf32>
    %48 = vector.broadcast %47 : vector<8x1xf32> to vector<8x8xf32>
    %49 = arith.mulf %44, %48 : vector<8x8xf32>
    %cst_20 = arith.constant dense<0.000000e+00> : vector<8x8xf32>
    %50 = tpu.matmul %49, %36, %cst_20 {dimension_numbers = #tpu.dot_dimension_numbers<[1], [0], [0], [1], [0, 0, 1, 1], [], []>} : vector<8x8xf32>, vector<8x8xf32>, vector<8x8xf32> -> vector<8x8xf32>
    %c0_21 = arith.constant 0 : index
    %c0_22 = arith.constant 0 : index
    %51 = vector.load %arg10[%c0_21, %c0_22] : memref<16x32xf32, #tpu.memory_space<vmem>>, vector<8x8xf32>
    tpu.vector_store %arg10[%c0_21, %c0_22], %50 {strides = array<i32>} : memref<16x32xf32, #tpu.memory_space<vmem>>, vector<8x8xf32>,
    %c0_23 = arith.constant 0 : index
    %c96 = arith.constant 96 : index
    %52 = vector.load %arg9[%c0_23, %c96] : memref<16x128xf32, #tpu.memory_space<vmem>>, vector<8x8xf32>
    tpu.vector_store %arg9[%c0_23, %c96], %49 {strides = array<i32>} : memref<16x128xf32, #tpu.memory_space<vmem>>, vector<8x8xf32>,
    %53 = vector.extract_strided_slice %27 {offsets = [0, 8], sizes = [8, 8], strides = [1, 1]} : vector<16x32xf32> to vector<8x8xf32>
    %54 = vector.extract_strided_slice %28 {offsets = [0, 8], sizes = [8, 8], strides = [1, 1]} : vector<16x32xf32> to vector<8x8xf32>
    %55 = vector.extract_strided_slice %29 {offsets = [0, 8], sizes = [8, 8], strides = [1, 1]} : vector<16x32xf32> to vector<8x8xf32>
    %56 = tpu.transpose %54, [1, 0] : vector<8x8xf32> -> vector<8x8xf32>
    %cst_24 = arith.constant dense<0.000000e+00> : vector<8x8xf32>
    %57 = tpu.matmul %53, %56, %cst_24 {dimension_numbers = #tpu.dot_dimension_numbers<[1], [0], [0], [1], [0, 0, 1, 1], [], []>} : vector<8x8xf32>, vector<8x8xf32>, vector<8x8xf32> -> vector<8x8xf32>
    %58 = arith.addf %57, %33 : vector<8x8xf32>
    %cst_25 = arith.constant dense<0xFF800000> : vector<8xf32>
    %59 = vector.multi_reduction <maximumf>, %58, %cst_25 [1] : vector<8x8xf32> to vector<8xf32>
    %60 = vector.shape_cast %59 : vector<8xf32> to vector<8x1xf32>
    %61 = vector.broadcast %60 : vector<8x1xf32> to vector<8x8xf32>
    %62 = arith.subf %58, %61 : vector<8x8xf32>
    %63 = math.exp %62 : vector<8x8xf32>
    %cst_26 = arith.constant dense<0.000000e+00> : vector<8xf32>
    %64 = vector.multi_reduction <add>, %63, %cst_26 [1] : vector<8x8xf32> to vector<8xf32>
    %65 = vector.shape_cast %64 : vector<8xf32> to vector<8x1xf32>
    %66 = tpu.reciprocal %65 {approx = true} : vector<8x1xf32> -> vector<8x1xf32>
    %67 = vector.broadcast %66 : vector<8x1xf32> to vector<8x8xf32>
    %68 = arith.mulf %63, %67 : vector<8x8xf32>
    %cst_27 = arith.constant dense<0.000000e+00> : vector<8x8xf32>
    %69 = tpu.matmul %68, %55, %cst_27 {dimension_numbers = #tpu.dot_dimension_numbers<[1], [0], [0], [1], [0, 0, 1, 1], [], []>} : vector<8x8xf32>, vector<8x8xf32>, vector<8x8xf32> -> vector<8x8xf32>
    %c0_28 = arith.constant 0 : index
    %c8 = arith.constant 8 : index
    %70 = vector.load %arg10[%c0_28, %c8] : memref<16x32xf32, #tpu.memory_space<vmem>>, vector<8x8xf32>
    tpu.vector_store %arg10[%c0_28, %c8], %69 {strides = array<i32>} : memref<16x32xf32, #tpu.memory_space<vmem>>, vector<8x8xf32>,
    %c0_29 = arith.constant 0 : index
    %c104 = arith.constant 104 : index
    %71 = vector.load %arg9[%c0_29, %c104] : memref<16x128xf32, #tpu.memory_space<vmem>>, vector<8x8xf32>
    tpu.vector_store %arg9[%c0_29, %c104], %68 {strides = array<i32>} : memref<16x128xf32, #tpu.memory_space<vmem>>, vector<8x8xf32>,
    %72 = vector.extract_strided_slice %27 {offsets = [0, 16], sizes = [8, 8], strides = [1, 1]} : vector<16x32xf32> to vector<8x8xf32>
    %73 = vector.extract_strided_slice %28 {offsets = [0, 16], sizes = [8, 8], strides = [1, 1]} : vector<16x32xf32> to vector<8x8xf32>
    %74 = vector.extract_strided_slice %29 {offsets = [0, 16], sizes = [8, 8], strides = [1, 1]} : vector<16x32xf32> to vector<8x8xf32>
    %75 = tpu.transpose %73, [1, 0] : vector<8x8xf32> -> vector<8x8xf32>
    %cst_30 = arith.constant dense<0.000000e+00> : vector<8x8xf32>
    %76 = tpu.matmul %72, %75, %cst_30 {dimension_numbers = #tpu.dot_dimension_numbers<[1], [0], [0], [1], [0, 0, 1, 1], [], []>} : vector<8x8xf32>, vector<8x8xf32>, vector<8x8xf32> -> vector<8x8xf32>
    %77 = arith.addf %76, %33 : vector<8x8xf32>
    %cst_31 = arith.constant dense<0xFF800000> : vector<8xf32>
    %78 = vector.multi_reduction <maximumf>, %77, %cst_31 [1] : vector<8x8xf32> to vector<8xf32>
    %79 = vector.shape_cast %78 : vector<8xf32> to vector<8x1xf32>
    %80 = vector.broadcast %79 : vector<8x1xf32> to vector<8x8xf32>
    %81 = arith.subf %77, %80 : vector<8x8xf32>
    %82 = math.exp %81 : vector<8x8xf32>
    %cst_32 = arith.constant dense<0.000000e+00> : vector<8xf32>
    %83 = vector.multi_reduction <add>, %82, %cst_32 [1] : vector<8x8xf32> to vector<8xf32>
    %84 = vector.shape_cast %83 : vector<8xf32> to vector<8x1xf32>
    %85 = tpu.reciprocal %84 {approx = true} : vector<8x1xf32> -> vector<8x1xf32>
    %86 = vector.broadcast %85 : vector<8x1xf32> to vector<8x8xf32>
    %87 = arith.mulf %82, %86 : vector<8x8xf32>
    %cst_33 = arith.constant dense<0.000000e+00> : vector<8x8xf32>
    %88 = tpu.matmul %87, %74, %cst_33 {dimension_numbers = #tpu.dot_dimension_numbers<[1], [0], [0], [1], [0, 0, 1, 1], [], []>} : vector<8x8xf32>, vector<8x8xf32>, vector<8x8xf32> -> vector<8x8xf32>
    %c0_34 = arith.constant 0 : index
    %c16 = arith.constant 16 : index
    %89 = vector.load %arg10[%c0_34, %c16] : memref<16x32xf32, #tpu.memory_space<vmem>>, vector<8x8xf32>
    tpu.vector_store %arg10[%c0_34, %c16], %88 {strides = array<i32>} : memref<16x32xf32, #tpu.memory_space<vmem>>, vector<8x8xf32>,
    %c0_35 = arith.constant 0 : index
    %c112 = arith.constant 112 : index
    %90 = vector.load %arg9[%c0_35, %c112] : memref<16x128xf32, #tpu.memory_space<vmem>>, vector<8x8xf32>
    tpu.vector_store %arg9[%c0_35, %c112], %87 {strides = array<i32>} : memref<16x128xf32, #tpu.memory_space<vmem>>, vector<8x8xf32>,
    %91 = vector.extract_strided_slice %27 {offsets = [0, 24], sizes = [8, 8], strides = [1, 1]} : vector<16x32xf32> to vector<8x8xf32>
    %92 = vector.extract_strided_slice %28 {offsets = [0, 24], sizes = [8, 8], strides = [1, 1]} : vector<16x32xf32> to vector<8x8xf32>
    %93 = vector.extract_strided_slice %29 {offsets = [0, 24], sizes = [8, 8], strides = [1, 1]} : vector<16x32xf32> to vector<8x8xf32>
    %94 = tpu.transpose %92, [1, 0] : vector<8x8xf32> -> vector<8x8xf32>
    %cst_36 = arith.constant dense<0.000000e+00> : vector<8x8xf32>
    %95 = tpu.matmul %91, %94, %cst_36 {dimension_numbers = #tpu.dot_dimension_numbers<[1], [0], [0], [1], [0, 0, 1, 1], [], []>} : vector<8x8xf32>, vector<8x8xf32>, vector<8x8xf32> -> vector<8x8xf32>
    %96 = arith.addf %95, %33 : vector<8x8xf32>
    %cst_37 = arith.constant dense<0xFF800000> : vector<8xf32>
    %97 = vector.multi_reduction <maximumf>, %96, %cst_37 [1] : vector<8x8xf32> to vector<8xf32>
    %98 = vector.shape_cast %97 : vector<8xf32> to vector<8x1xf32>
    %99 = vector.broadcast %98 : vector<8x1xf32> to vector<8x8xf32>
    %100 = arith.subf %96, %99 : vector<8x8xf32>
    %101 = math.exp %100 : vector<8x8xf32>
    %cst_38 = arith.constant dense<0.000000e+00> : vector<8xf32>
    %102 = vector.multi_reduction <add>, %101, %cst_38 [1] : vector<8x8xf32> to vector<8xf32>
    %103 = vector.shape_cast %102 : vector<8xf32> to vector<8x1xf32>
    %104 = tpu.reciprocal %103 {approx = true} : vector<8x1xf32> -> vector<8x1xf32>
    %105 = vector.broadcast %104 : vector<8x1xf32> to vector<8x8xf32>
    %106 = arith.mulf %101, %105 : vector<8x8xf32>
    %cst_39 = arith.constant dense<0.000000e+00> : vector<8x8xf32>
    %107 = tpu.matmul %106, %93, %cst_39 {dimension_numbers = #tpu.dot_dimension_numbers<[1], [0], [0], [1], [0, 0, 1, 1], [], []>} : vector<8x8xf32>, vector<8x8xf32>, vector<8x8xf32> -> vector<8x8xf32>
    %c0_40 = arith.constant 0 : index
    %c24 = arith.constant 24 : index
    %108 = vector.load %arg10[%c0_40, %c24] : memref<16x32xf32, #tpu.memory_space<vmem>>, vector<8x8xf32>
    tpu.vector_store %arg10[%c0_40, %c24], %107 {strides = array<i32>} : memref<16x32xf32, #tpu.memory_space<vmem>>, vector<8x8xf32>,
    %c0_41 = arith.constant 0 : index
    %c120 = arith.constant 120 : index
    %109 = vector.load %arg9[%c0_41, %c120] : memref<16x128xf32, #tpu.memory_space<vmem>>, vector<8x8xf32>
    tpu.vector_store %arg9[%c0_41, %c120], %106 {strides = array<i32>} : memref<16x128xf32, #tpu.memory_space<vmem>>, vector<8x8xf32>,
    %c1 = arith.constant 1 : index
    %c0_42 = arith.constant 0 : index
    %c0_43 = arith.constant 0 : index
    %110 = vector.load %arg8[%c1, %c0_42, %c0_43] : memref<2x8x8xf32, #tpu.memory_space<vmem>>, vector<1x8x8xf32>
    %111 = vector.shape_cast %110 : vector<1x8x8xf32> to vector<8x8xf32>
    %112 = vector.extract_strided_slice %27 {offsets = [8, 0], sizes = [8, 8], strides = [1, 1]} : vector<16x32xf32> to vector<8x8xf32>
    %113 = vector.extract_strided_slice %28 {offsets = [8, 0], sizes = [8, 8], strides = [1, 1]} : vector<16x32xf32> to vector<8x8xf32>
    %114 = vector.extract_strided_slice %29 {offsets = [8, 0], sizes = [8, 8], strides = [1, 1]} : vector<16x32xf32> to vector<8x8xf32>
    %115 = tpu.transpose %113, [1, 0] : vector<8x8xf32> -> vector<8x8xf32>
    %cst_44 = arith.constant dense<0.000000e+00> : vector<8x8xf32>
    %116 = tpu.matmul %112, %115, %cst_44 {dimension_numbers = #tpu.dot_dimension_numbers<[1], [0], [0], [1], [0, 0, 1, 1], [], []>} : vector<8x8xf32>, vector<8x8xf32>, vector<8x8xf32> -> vector<8x8xf32>
    %117 = arith.addf %116, %111 : vector<8x8xf32>
    %cst_45 = arith.constant dense<0xFF800000> : vector<8xf32>
    %118 = vector.multi_reduction <maximumf>, %117, %cst_45 [1] : vector<8x8xf32> to vector<8xf32>
    %119 = vector.shape_cast %118 : vector<8xf32> to vector<8x1xf32>
    %120 = vector.broadcast %119 : vector<8x1xf32> to vector<8x8xf32>
    %121 = arith.subf %117, %120 : vector<8x8xf32>
    %122 = math.exp %121 : vector<8x8xf32>
    %cst_46 = arith.constant dense<0.000000e+00> : vector<8xf32>
    %123 = vector.multi_reduction <add>, %122, %cst_46 [1] : vector<8x8xf32> to vector<8xf32>
    %124 = vector.shape_cast %123 : vector<8xf32> to vector<8x1xf32>
    %125 = tpu.reciprocal %124 {approx = true} : vector<8x1xf32> -> vector<8x1xf32>
    %126 = vector.broadcast %125 : vector<8x1xf32> to vector<8x8xf32>
    %127 = arith.mulf %122, %126 : vector<8x8xf32>
    %cst_47 = arith.constant dense<0.000000e+00> : vector<8x8xf32>
    %128 = tpu.matmul %127, %114, %cst_47 {dimension_numbers = #tpu.dot_dimension_numbers<[1], [0], [0], [1], [0, 0, 1, 1], [], []>} : vector<8x8xf32>, vector<8x8xf32>, vector<8x8xf32> -> vector<8x8xf32>
    %c8_48 = arith.constant 8 : index
    %c0_49 = arith.constant 0 : index
    %129 = vector.load %arg10[%c8_48, %c0_49] : memref<16x32xf32, #tpu.memory_space<vmem>>, vector<8x8xf32>
    tpu.vector_store %arg10[%c8_48, %c0_49], %128 {strides = array<i32>} : memref<16x32xf32, #tpu.memory_space<vmem>>, vector<8x8xf32>,
    %c8_50 = arith.constant 8 : index
    %c96_51 = arith.constant 96 : index
    %130 = vector.load %arg9[%c8_50, %c96_51] : memref<16x128xf32, #tpu.memory_space<vmem>>, vector<8x8xf32>
    tpu.vector_store %arg9[%c8_50, %c96_51], %127 {strides = array<i32>} : memref<16x128xf32, #tpu.memory_space<vmem>>, vector<8x8xf32>,
    %131 = vector.extract_strided_slice %27 {offsets = [8, 8], sizes = [8, 8], strides = [1, 1]} : vector<16x32xf32> to vector<8x8xf32>
    %132 = vector.extract_strided_slice %28 {offsets = [8, 8], sizes = [8, 8], strides = [1, 1]} : vector<16x32xf32> to vector<8x8xf32>
    %133 = vector.extract_strided_slice %29 {offsets = [8, 8], sizes = [8, 8], strides = [1, 1]} : vector<16x32xf32> to vector<8x8xf32>
    %134 = tpu.transpose %132, [1, 0] : vector<8x8xf32> -> vector<8x8xf32>
    %cst_52 = arith.constant dense<0.000000e+00> : vector<8x8xf32>
    %135 = tpu.matmul %131, %134, %cst_52 {dimension_numbers = #tpu.dot_dimension_numbers<[1], [0], [0], [1], [0, 0, 1, 1], [], []>} : vector<8x8xf32>, vector<8x8xf32>, vector<8x8xf32> -> vector<8x8xf32>
    %136 = arith.addf %135, %111 : vector<8x8xf32>
    %cst_53 = arith.constant dense<0xFF800000> : vector<8xf32>
    %137 = vector.multi_reduction <maximumf>, %136, %cst_53 [1] : vector<8x8xf32> to vector<8xf32>
    %138 = vector.shape_cast %137 : vector<8xf32> to vector<8x1xf32>
    %139 = vector.broadcast %138 : vector<8x1xf32> to vector<8x8xf32>
    %140 = arith.subf %136, %139 : vector<8x8xf32>
    %141 = math.exp %140 : vector<8x8xf32>
    %cst_54 = arith.constant dense<0.000000e+00> : vector<8xf32>
    %142 = vector.multi_reduction <add>, %141, %cst_54 [1] : vector<8x8xf32> to vector<8xf32>
    %143 = vector.shape_cast %142 : vector<8xf32> to vector<8x1xf32>
    %144 = tpu.reciprocal %143 {approx = true} : vector<8x1xf32> -> vector<8x1xf32>
    %145 = vector.broadcast %144 : vector<8x1xf32> to vector<8x8xf32>
    %146 = arith.mulf %141, %145 : vector<8x8xf32>
    %cst_55 = arith.constant dense<0.000000e+00> : vector<8x8xf32>
    %147 = tpu.matmul %146, %133, %cst_55 {dimension_numbers = #tpu.dot_dimension_numbers<[1], [0], [0], [1], [0, 0, 1, 1], [], []>} : vector<8x8xf32>, vector<8x8xf32>, vector<8x8xf32> -> vector<8x8xf32>
    %c8_56 = arith.constant 8 : index
    %c8_57 = arith.constant 8 : index
    %148 = vector.load %arg10[%c8_56, %c8_57] : memref<16x32xf32, #tpu.memory_space<vmem>>, vector<8x8xf32>
    tpu.vector_store %arg10[%c8_56, %c8_57], %147 {strides = array<i32>} : memref<16x32xf32, #tpu.memory_space<vmem>>, vector<8x8xf32>,
    %c8_58 = arith.constant 8 : index
    %c104_59 = arith.constant 104 : index
    %149 = vector.load %arg9[%c8_58, %c104_59] : memref<16x128xf32, #tpu.memory_space<vmem>>, vector<8x8xf32>
    tpu.vector_store %arg9[%c8_58, %c104_59], %146 {strides = array<i32>} : memref<16x128xf32, #tpu.memory_space<vmem>>, vector<8x8xf32>,
    %150 = vector.extract_strided_slice %27 {offsets = [8, 16], sizes = [8, 8], strides = [1, 1]} : vector<16x32xf32> to vector<8x8xf32>
    %151 = vector.extract_strided_slice %28 {offsets = [8, 16], sizes = [8, 8], strides = [1, 1]} : vector<16x32xf32> to vector<8x8xf32>
    %152 = vector.extract_strided_slice %29 {offsets = [8, 16], sizes = [8, 8], strides = [1, 1]} : vector<16x32xf32> to vector<8x8xf32>
    %153 = tpu.transpose %151, [1, 0] : vector<8x8xf32> -> vector<8x8xf32>
    %cst_60 = arith.constant dense<0.000000e+00> : vector<8x8xf32>
    %154 = tpu.matmul %150, %153, %cst_60 {dimension_numbers = #tpu.dot_dimension_numbers<[1], [0], [0], [1], [0, 0, 1, 1], [], []>} : vector<8x8xf32>, vector<8x8xf32>, vector<8x8xf32> -> vector<8x8xf32>
    %155 = arith.addf %154, %111 : vector<8x8xf32>
    %cst_61 = arith.constant dense<0xFF800000> : vector<8xf32>
    %156 = vector.multi_reduction <maximumf>, %155, %cst_61 [1] : vector<8x8xf32> to vector<8xf32>
    %157 = vector.shape_cast %156 : vector<8xf32> to vector<8x1xf32>
    %158 = vector.broadcast %157 : vector<8x1xf32> to vector<8x8xf32>
    %159 = arith.subf %155, %158 : vector<8x8xf32>
    %160 = math.exp %159 : vector<8x8xf32>
    %cst_62 = arith.constant dense<0.000000e+00> : vector<8xf32>
    %161 = vector.multi_reduction <add>, %160, %cst_62 [1] : vector<8x8xf32> to vector<8xf32>
    %162 = vector.shape_cast %161 : vector<8xf32> to vector<8x1xf32>
    %163 = tpu.reciprocal %162 {approx = true} : vector<8x1xf32> -> vector<8x1xf32>
    %164 = vector.broadcast %163 : vector<8x1xf32> to vector<8x8xf32>
    %165 = arith.mulf %160, %164 : vector<8x8xf32>
    %cst_63 = arith.constant dense<0.000000e+00> : vector<8x8xf32>
    %166 = tpu.matmul %165, %152, %cst_63 {dimension_numbers = #tpu.dot_dimension_numbers<[1], [0], [0], [1], [0, 0, 1, 1], [], []>} : vector<8x8xf32>, vector<8x8xf32>, vector<8x8xf32> -> vector<8x8xf32>
    %c8_64 = arith.constant 8 : index
    %c16_65 = arith.constant 16 : index
    %167 = vector.load %arg10[%c8_64, %c16_65] : memref<16x32xf32, #tpu.memory_space<vmem>>, vector<8x8xf32>
    tpu.vector_store %arg10[%c8_64, %c16_65], %166 {strides = array<i32>} : memref<16x32xf32, #tpu.memory_space<vmem>>, vector<8x8xf32>,
    %c8_66 = arith.constant 8 : index
    %c112_67 = arith.constant 112 : index
    %168 = vector.load %arg9[%c8_66, %c112_67] : memref<16x128xf32, #tpu.memory_space<vmem>>, vector<8x8xf32>
    tpu.vector_store %arg9[%c8_66, %c112_67], %165 {strides = array<i32>} : memref<16x128xf32, #tpu.memory_space<vmem>>, vector<8x8xf32>,
    %169 = vector.extract_strided_slice %27 {offsets = [8, 24], sizes = [8, 8], strides = [1, 1]} : vector<16x32xf32> to vector<8x8xf32>
    %170 = vector.extract_strided_slice %28 {offsets = [8, 24], sizes = [8, 8], strides = [1, 1]} : vector<16x32xf32> to vector<8x8xf32>
    %171 = vector.extract_strided_slice %29 {offsets = [8, 24], sizes = [8, 8], strides = [1, 1]} : vector<16x32xf32> to vector<8x8xf32>
    %172 = tpu.transpose %170, [1, 0] : vector<8x8xf32> -> vector<8x8xf32>
    %cst_68 = arith.constant dense<0.000000e+00> : vector<8x8xf32>
    %173 = tpu.matmul %169, %172, %cst_68 {dimension_numbers = #tpu.dot_dimension_numbers<[1], [0], [0], [1], [0, 0, 1, 1], [], []>} : vector<8x8xf32>, vector<8x8xf32>, vector<8x8xf32> -> vector<8x8xf32>
    %174 = arith.addf %173, %111 : vector<8x8xf32>
    %cst_69 = arith.constant dense<0xFF800000> : vector<8xf32>
    %175 = vector.multi_reduction <maximumf>, %174, %cst_69 [1] : vector<8x8xf32> to vector<8xf32>
    %176 = vector.shape_cast %175 : vector<8xf32> to vector<8x1xf32>
    %177 = vector.broadcast %176 : vector<8x1xf32> to vector<8x8xf32>
    %178 = arith.subf %174, %177 : vector<8x8xf32>
    %179 = math.exp %178 : vector<8x8xf32>
    %cst_70 = arith.constant dense<0.000000e+00> : vector<8xf32>
    %180 = vector.multi_reduction <add>, %179, %cst_70 [1] : vector<8x8xf32> to vector<8xf32>
    %181 = vector.shape_cast %180 : vector<8xf32> to vector<8x1xf32>
    %182 = tpu.reciprocal %181 {approx = true} : vector<8x1xf32> -> vector<8x1xf32>
    %183 = vector.broadcast %182 : vector<8x1xf32> to vector<8x8xf32>
    %184 = arith.mulf %179, %183 : vector<8x8xf32>
    %cst_71 = arith.constant dense<0.000000e+00> : vector<8x8xf32>
    %185 = tpu.matmul %184, %171, %cst_71 {dimension_numbers = #tpu.dot_dimension_numbers<[1], [0], [0], [1], [0, 0, 1, 1], [], []>} : vector<8x8xf32>, vector<8x8xf32>, vector<8x8xf32> -> vector<8x8xf32>
    %c8_72 = arith.constant 8 : index
    %c24_73 = arith.constant 24 : index
    %186 = vector.load %arg10[%c8_72, %c24_73] : memref<16x32xf32, #tpu.memory_space<vmem>>, vector<8x8xf32>
    tpu.vector_store %arg10[%c8_72, %c24_73], %185 {strides = array<i32>} : memref<16x32xf32, #tpu.memory_space<vmem>>, vector<8x8xf32>,
    %c8_74 = arith.constant 8 : index
    %c120_75 = arith.constant 120 : index
    %187 = vector.load %arg9[%c8_74, %c120_75] : memref<16x128xf32, #tpu.memory_space<vmem>>, vector<8x8xf32>
    tpu.vector_store %arg9[%c8_74, %c120_75], %184 {strides = array<i32>} : memref<16x128xf32, #tpu.memory_space<vmem>>, vector<8x8xf32>,
    %c0_76 = arith.constant 0 : index
    %c0_77 = arith.constant 0 : index
    %188 = vector.load %arg10[%c0_76, %c0_77] : memref<16x32xf32, #tpu.memory_space<vmem>>, vector<16x32xf32>
    %189 = math.absf %188 : vector<16x32xf32>
    %cst_78 = arith.constant dense<0xFF800000> : vector<16xf32>
    %190 = vector.multi_reduction <maximumf>, %189, %cst_78 [1] : vector<16x32xf32> to vector<16xf32>
    %191 = vector.shape_cast %190 : vector<16xf32> to vector<16x1xf32>
    %cst_79 = arith.constant 1.270000e+02 : f32
    %192 = vector.broadcast %cst_79 : f32 to vector<16x1xf32>
    %193 = arith.divf %191, %192 : vector<16x1xf32>
    %cst_80 = arith.constant 9.99999974E-6 : f32
    %194 = vector.broadcast %cst_80 : f32 to vector<16x1xf32>
    %195 = arith.maximumf %193, %194 : vector<16x1xf32>
    %196 = tpu.reciprocal %195 : vector<16x1xf32> -> vector<16x1xf32>
    %197 = vector.broadcast %196 : vector<16x1xf32> to vector<16x32xf32>
    %198 = arith.mulf %188, %197 : vector<16x32xf32>
    %199 = math.roundeven %198 : vector<16x32xf32>
    %cst_81 = arith.constant -1.270000e+02 : f32
    %cst_82 = arith.constant 1.270000e+02 : f32
    %200 = vector.broadcast %cst_81 : f32 to vector<16x32xf32>
    %201 = arith.maximumf %200, %199 : vector<16x32xf32>
    %202 = vector.broadcast %cst_82 : f32 to vector<16x32xf32>
    %203 = arith.minimumf %202, %201 : vector<16x32xf32>
    %204 = arith.truncf %203 : vector<16x32xf32> to vector<16x32xbf16>
    %c0_83 = arith.constant 0 : index
    %c0_84 = arith.constant 0 : index
    %205 = vector.load %arg5[%c0_83, %c0_84] : memref<32x32xbf16, #tpu.memory_space<vmem>>, vector<32x32xbf16>
    %cst_85 = arith.constant dense<0.000000e+00> : vector<16x32xf32>
    %206 = tpu.matmul %204, %205, %cst_85 {dimension_numbers = #tpu.dot_dimension_numbers<[1], [0], [0], [1], [0, 0, 1, 1], [], []>} : vector<16x32xbf16>, vector<32x32xbf16>, vector<16x32xf32> -> vector<16x32xf32>
    %c0_86 = arith.constant 0 : index
    %c0_87 = arith.constant 0 : index
    %207 = vector.load %arg6[%c0_86, %c0_87] : memref<1x32xf32, #tpu.memory_space<vmem>>, vector<1x32xf32>
    %208 = vector.broadcast %195 : vector<16x1xf32> to vector<16x32xf32>
    %209 = vector.broadcast %207 : vector<1x32xf32> to vector<16x32xf32>
    %210 = arith.mulf %208, %209 : vector<16x32xf32>
    %211 = arith.mulf %206, %210 : vector<16x32xf32>
    %c0_88 = arith.constant 0 : index
    %c0_89 = arith.constant 0 : index
    %212 = vector.load %arg7[%c0_88, %c0_89] : memref<1x32xf32, #tpu.memory_space<vmem>>, vector<1x32xf32>
    %213 = vector.broadcast %212 : vector<1x32xf32> to vector<16x32xf32>
    %214 = arith.addf %211, %213 : vector<16x32xf32>
    %c0_90 = arith.constant 0 : index
    %c0_91 = arith.constant 0 : index
    %215 = vector.load %arg9[%c0_90, %c0_91] : memref<16x128xf32, #tpu.memory_space<vmem>>, vector<16x32xf32>
    tpu.vector_store %arg9[%c0_90, %c0_91], %214 {strides = array<i32>} : memref<16x128xf32, #tpu.memory_space<vmem>>, vector<16x32xf32>,
    return
  }
  func.func @transform_0(%arg0: i32) -> (i32, i32) {
    %c0_i32 = arith.constant 0 : i32
    %c0_i32_0 = arith.constant 0 : i32
    %c0_i32_1 = arith.constant 0 : i32
    return %c0_i32, %c0_i32_0 : i32, i32
  }
  func.func @transform_1(%arg0: i32) -> (i32, i32) {
    %c0_i32 = arith.constant 0 : i32
    %c0_i32_0 = arith.constant 0 : i32
    %c0_i32_1 = arith.constant 0 : i32
    return %c0_i32, %c0_i32_0 : i32, i32
  }
  func.func @transform_2(%arg0: i32) -> (i32, i32) {
    %c0_i32 = arith.constant 0 : i32
    %c0_i32_0 = arith.constant 0 : i32
    %c0_i32_1 = arith.constant 0 : i32
    return %c0_i32, %c0_i32_0 : i32, i32
  }
  func.func @transform_3(%arg0: i32) -> (i32, i32) {
    %c0_i32 = arith.constant 0 : i32
    %c0_i32_0 = arith.constant 0 : i32
    %c0_i32_1 = arith.constant 0 : i32
    return %c0_i32, %c0_i32_0 : i32, i32
  }
  func.func @transform_4(%arg0: i32) -> (i32, i32) {
    %c0_i32 = arith.constant 0 : i32
    %c0_i32_0 = arith.constant 0 : i32
    %c0_i32_1 = arith.constant 0 : i32
    return %c0_i32, %c0_i32_0 : i32, i32
  }
  func.func @transform_5(%arg0: i32) -> (i32, i32) {
    %c0_i32 = arith.constant 0 : i32
    %c0_i32_0 = arith.constant 0 : i32
    %c0_i32_1 = arith.constant 0 : i32
    return %c0_i32, %c0_i32_0 : i32, i32
  }
  func.func @transform_6(%arg0: i32) -> (i32, i32) {
    %c0_i32 = arith.constant 0 : i32
    %c0_i32_0 = arith.constant 0 : i32
    %c0_i32_1 = arith.constant 0 : i32
    return %c0_i32, %c0_i32_0 : i32, i32
  }
  func.func @transform_7(%arg0: i32) -> (i32, i32, i32) {
    %c0_i32 = arith.constant 0 : i32
    %c0_i32_0 = arith.constant 0 : i32
    %c0_i32_1 = arith.constant 0 : i32
    %c0_i32_2 = arith.constant 0 : i32
    return %c0_i32, %c0_i32_0, %c0_i32_1 : i32, i32, i32
  }
  func.func @transform_8(%arg0: i32) -> (i32, i32) {
    %c0_i32 = arith.constant 0 : i32
    %c0_i32_0 = arith.constant 0 : i32
    %c0_i32_1 = arith.constant 0 : i32
    return %c0_i32, %c0_i32_0 : i32, i32
  }
}

</mosaic_0001>

<bundles_post_ra>
// kernel: tpu_custom_call.1
= control target key start
LH: loop header
LB: loop body
LE: loop exit
PB: predicated region body
PF: predicated region fallthrough
CT: control target
= control target key end

     0   :  { %13 = vsyncpa [#allocation4], 0  ;;  %s2377_s0 = inlined_call_operand.hbm [shape: f32[16,32], index: 0, kind: input, shape index: {}]   ;;  %s2378_s1 = inlined_call_operand.hbm [shape: bf16[32,96], index: 1, kind: input, shape index: {}]   ;;  %s2379_s2 = inlined_call_operand.vmem [shape: f32[1,96], index: 2, kind: input, shape index: {}]   ;;  %s2380_s3 = inlined_call_operand.vmem [shape: f32[1,96], index: 3, kind: input, shape index: {}]   ;;  %s2381_s4 = inlined_call_operand.hbm [shape: bf16[32,32], index: 4, kind: input, shape index: {}]   ;;  %s2382_s5 = inlined_call_operand.vmem [shape: f32[1,32], index: 5, kind: input, shape index: {}]   ;;  %s2383_s6 = inlined_call_operand.vmem [shape: f32[1,32], index: 6, kind: input, shape index: {}]   ;;  %s2384_s7 = inlined_call_operand.vmem [shape: f32[2,8,8], index: 7, kind: input, shape index: {}]   ;;  %s2385_s8 = inlined_call_operand.hbm [shape: f32[16,128], index: 8, kind: output, shape index: {}]  }
   0x1   :  { %14 = vsyncpa [#allocation7], 0 }
   0x2   :  { %15 = vsyncpa [#allocation5], 0  ;;  %s2040_s27 = smov [#allocation6]   ;;  %s1946_s9 = scalar_lea.hbm %s2378_s1, 256 }
   0x3   :  { %s33_s28 = sshll.u32 %s2040_s27, 4  ;;  %p1947_p0 = scmp.ne.s32.totalorder %s2378_s1, %s1946_s9  ;;  %s34_s28 = int_to_ptr.vmem [resolvable:$true] %s33_s28 }
   0x4   :  { %p1950_p1 = scmp.lt.u32.totalorder %s1946_s9, %s2378_s1 }
   0x6   :  { %p1952_p2 = pnand %p1950_p1, %p1947_p0 }
   0x8   :  { %1955 = shalt.err (!%p1952_p2)
}
   0x9   :  { %s1956_s14 = scalar_lea.vmem %s34_s28, 256  ;;  %p1961_p4 = scmp.lt.s32.totalorder %s34_s28, %s34_s28 }
   0xa   :  { %p1957_p3 = scmp.ne.s32.totalorder %s34_s28, %s1956_s14  ;;  %p1962_p5 = scmp.lt.s32.totalorder %s1956_s14, %s1956_s14 }
   0xc   :  { %p1963_p6 = por %p1962_p5, %p1961_p4 }
   0xe   :  { %p1964_p7 = pnand %p1963_p6, %p1957_p3 }
  0x10   :  { %1967 = shalt.err (!%p1964_p7)
}
  0x11   :  { %s2041_s15 = smov 64   ;;  %s2042_s16 = smov 4  }
  0x12   :  { %39 = dma.hbm_to_vmem [thread:$0]  %s2378_s1, 256, %s34_s28, [#allocation7], %s2041_s15, %s2041_s15, %s2042_s16  }
  0x13   :  { %s2043_s19 = smov [#allocation3]   ;;  %s1968_s23 = scalar_lea.hbm %s2377_s0, 256 }
  0x14   :  { %s21_s20 = sshll.u32 %s2043_s19, 4  ;;  %p1969_p8 = scmp.ne.s32.totalorder %s2377_s0, %s1968_s23  ;;  %s22_s20 = int_to_ptr.vmem [resolvable:$true] %s21_s20 }
  0x15   :  { %p1972_p9 = scmp.lt.u32.totalorder %s1968_s23, %s2377_s0 }
  0x17   :  { %p1974_p10 = pnand %p1972_p9, %p1969_p8 }
  0x19   :  { %1977 = shalt.err (!%p1974_p10)
}
  0x1a   :  { %s1978_s29 = scalar_lea.vmem %s22_s20, 256  ;;  %p1983_p12 = scmp.lt.s32.totalorder %s22_s20, %s22_s20 }
  0x1b   :  { %p1979_p11 = scmp.ne.s32.totalorder %s22_s20, %s1978_s29  ;;  %p1984_p13 = scmp.lt.s32.totalorder %s1978_s29, %s1978_s29 }
  0x1d   :  { %p1985_p0 = por %p1984_p13, %p1983_p12 }
  0x1f   :  { %p1986_p1 = pnand %p1985_p0, %p1979_p11 }
  0x21   :  { %1989 = shalt.err (!%p1986_p1)
}
  0x22   :  { %s2044_s1 = smov 128   ;;  %s2045_s28 = smov 8  }
  0x23   :  { %27 = dma.hbm_to_vmem [thread:$0]  %s2377_s0, 256, %s22_s20, [#allocation4], %s2044_s1, %s2044_s1, %s2045_s28  }
  0x24   :  { %s2046_s10 = smov [#allocation8]   ;;  %s1990_s14 = scalar_lea.hbm %s2381_s4, 256 }
  0x25   :  { %s49_s11 = sshll.u32 %s2046_s10, 4  ;;  %p1991_p2 = scmp.ne.s32.totalorder %s2381_s4, %s1990_s14  ;;  %s50_s11 = int_to_ptr.vmem [resolvable:$true] %s49_s11 }
  0x26   :  { %p1994_p3 = scmp.lt.u32.totalorder %s1990_s14, %s2381_s4 }
  0x28   :  { %p1996_p4 = pnand %p1994_p3, %p1991_p2 }
  0x2a   :  { %1999 = shalt.err (!%p1996_p4)
}
  0x2b   :  { %s2000_s22 = scalar_lea.vmem %s50_s11, 256  ;;  %p2005_p6 = scmp.lt.s32.totalorder %s50_s11, %s50_s11 }
  0x2c   :  { %p2001_p5 = scmp.ne.s32.totalorder %s50_s11, %s2000_s22  ;;  %p2006_p7 = scmp.lt.s32.totalorder %s2000_s22, %s2000_s22 }
  0x2e   :  { %p2007_p8 = por %p2006_p7, %p2005_p6 }
  0x30   :  { %p2008_p9 = pnand %p2007_p8, %p2001_p5 }
  0x32   :  { %2011 = shalt.err (!%p2008_p9)
}
  0x33   :  { %55 = dma.hbm_to_vmem [thread:$0]  %s2381_s4, 256, %s50_s11, [#allocation7], %s2041_s15, %s2041_s15, %s2042_s16  }
  0x34   :  { %2034 = dma.done.wait [#allocation4], 256  }
  0x35   :  { %2035 = vsyncadd [#allocation4], 4294967040 }
  0x36   :  { %2036 = dma.done.wait [#allocation7], 512  }
  0x37   :  { %2037 = vsyncadd [#allocation7], 4294966784  ;;  %v72_v0 = vld [vmem:[#allocation3] sm:$0xff]  ;;  %vm76_vm0 = vcmask 261120   ;;  %v73_v1 = vld [vmem:[#allocation3 + $0x8] sm:$0xff]  ;;  %v2047_v7 = vmov 0.0  }
  0x38   :  { %v74_v2 = vand.u32 2147483647, %v72_v0  ;;  %v75_v3 = vand.u32 2147483647, %v73_v1  ;;  %v1902_v6 = vld [vmem:[#allocation6] sm:$0xff]   ;;  %1780 = vmatprep.subr.bf16.mxu0 %v2047_v7  ;;  %vm2048_vm1 = vmmov 0   ;;  %1793 = vmatprep.subr.mxu1 %v2047_v7 }
  0x39   :  { %1784 = vmatprep.mubr.msk.bf16.mxu0 %vm2048_vm1, %v2047_v7  ;;  %1781 = vmatpush3.bf16.msra.mxu0 %v1902_v6  ;;  %v1903_v8 = vld [vmem:[#allocation6 + $0x8] sm:$0xff]   ;;  %v1708_v24 = vld [vmem:[%s2379_s2] ss:$0 sm:$0xff]  ;;  %vm179_vm2 = vcmask 523520   ;;  %vm182_vm3 = vcmask 785920   ;;  %s2049_s2 = smov 96  }
  0x3a   :  { %v77_v4 = vsel %vm76_vm0, %v74_v2, -inf  ;;  %v80_v5 = vsel %vm76_vm0, %v75_v3, -inf  ;;  %1782 = vmatprep.subr.bf16.mxu0 %v2047_v7  ;;  %1795 = vmatprep.mubr.msk.f32.mxu1 %vm2048_vm1, %v2047_v7  ;;  %v1709_v27 = vld [vmem:[%s2380_s3] ss:$0 sm:$0xff]  ;;  %s2050_s3 = smov 88   ;;  %s2051_s25 = smov 120  }
  0x3b   :  { %78 = vmax.xlane.f32.xlu0 %v77_v4  ;;  %vm189_vm4 = vcmask 64512   ;;  %v2196_v38 = vld [vmem:[%s2384_s7] sm:$0xff]  ;;  %s2052_s29 = smov 80   ;;  %s2053_s30 = smov 72   ;;  %vm526_vm5 = vcmask 130112   ;;  %vm702_vm6 = vcmask 195712  }
  0x3c   :  { %s2054_s9 = smov 112   ;;  %s2055_s10 = smov 104   ;;  %vm878_vm7 = vcmask 261312   ;;  %vm355_vm8 = vcmask 851712   ;;  %vm531_vm9 = vcmask 917312   ;;  %vm707_vm10 = vcmask 982912  }
  0x3d   :  { %1783 = vmatpush3.bf16.msra.mxu0 %v1903_v8  ;;  %s2057_s13 = smov 40   ;;  %s2059_s14 = smov 16   ;;  %vm883_vm11 = vcmask 1048512  }
  0x3e   :  { %1788 = vmatprep.subr.mxu0 %v2047_v7  ;;  %s2060_s17 = smov 24   ;;  %s2061_s0 = smov [#allocation9]  }
  0x3f   :  { %81 = vmax.xlane.f32.xlu0 %v80_v5  ;;  %s1690_s20 = sshll.u32 %s2061_s0, 4  ;;  %s1691_s20 = int_to_ptr.vmem [resolvable:$true] %s1690_s20 }
  0x40   :  { %p2017_p11 = scmp.lt.s32.totalorder %s1691_s20, %s1691_s20 }
  0xc8   :  { %v79_v9 = vpop.xlane.xlu0 %78 }
  0xc9   :  { %v84_v10 = vmul.f32 0.007874016, %v79_v9 }
  0xcb   :  { %v86_v11 = vmax.f32 %v84_v10, 1e-05 }
  0xcc   :  { %v82_v12 = vpop.xlane.xlu0 %81 }
  0xcd   :  { %1906 = vrcp.f32 %v86_v11  ;;  %v85_v13 = vmul.f32 0.007874016, %v82_v12  ;;  %v166_v25 = vmul.f32 %v1708_v24, %v86_v11 }
  0xcf   :  { %v87_v14 = vmax.f32 %v85_v13, 1e-05 }
  0xd1   :  { %1908 = vrcp.f32 %v87_v14  ;;  %v167_v30 = vmul.f32 %v1708_v24, %v87_v14  ;;  %v1722_v14 = vld [vmem:[%s2384_s7 + $0x8] sm:$0xff]  ;;  %s2056_s7 = smov 56  }
  0xd7   :  { %v1907_v15 = vpop.eup %1906 }
  0xd8   :  { %v90_v16 = vmul.f32 %v1907_v15, %v72_v0 }
  0xda   :  { %v1876_v19 = vround.rtne.f32 %v90_v16 }
  0xdb   :  { %v1909_v17 = vpop.eup %1908 }
  0xdc   :  { %v91_v18 = vmul.f32 %v1909_v17, %v73_v1  ;;  %v1703_v21 = vclamps-f32 %v1876_v19, 127.0 }
  0xde   :  { %v1877_v20 = vround.rtne.f32 %v91_v18 }
  0xe0   :  { %v1704_v22 = vclamps-f32 %v1877_v20, 127.0 }
  0xe2   :  { %v98_v23 = vpack.c.bf16 %v1704_v22, %v1703_v21 }
  0xe4   :  { %1785 = vmatmul.mubr.msk.bf16.vlgmr.msra.gmra.mrb[0].mxu0 %vm76_vm0, %v98_v23 }
  0xe5   :  { %1790 = vmatprep.mubr.msk.f32.mxu0 %vm2048_vm1, %v2047_v7 }
 0x1b7   :  { %v152_v26 = vpop.f32.mrb[0].mxu0 }
 0x1b8   :  { %v168_v28 = vmul.f32 %v166_v25, %v152_v26  ;;  %v1786_v29 = vpop.f32.mrb[1].mxu0 }
 0x1b9   :  { %v155_v31 = vpop.f32.mrb[2].mxu0 }
 0x1ba   :  { %v2171_v32 = vadd.f32 %v1709_v27, %v168_v28  ;;  %v169_v33 = vmul.f32 %v167_v30, %v155_v31  ;;  %v1787_v34 = vpop.f32.mrb[3].mxu0 }
 0x1bc   :  { %v2173_v35 = vadd.f32 %v1709_v27, %v169_v33  ;;  %275 = vrot.lane.b32.xlu0 %v2171_v32, %s2041_s15  ;;  %187 = vrot.lane.b32.xlu1 %v2171_v32, %s2049_s2  ;;  %180 = vst.msk [vmem:[#allocation9] sm:$0xff] %vm179_vm2, %v2171_v32 }
 0x1bd   :  { %183 = vst.msk [vmem:[#allocation9] sm:$0xff] %vm182_vm3, %v2171_v32 }
 0x1be   :  { %181 = vst.msk [vmem:[#allocation9 + $0x8] sm:$0xff] %vm179_vm2, %v2173_v35 }
 0x1bf   :  { %184 = vst.msk [vmem:[#allocation9 + $0x8] sm:$0xff] %vm182_vm3, %v2173_v35 }
 0x1c0   :  { %359 = vrot.lane.b32.xlu0 %v2171_v32, %s2050_s3 }
 0x1c4   :  { %357 = vrot.lane.b32.xlu0 %v2171_v32, %s2051_s25 }
 0x22e   :  { %v276_v36 = vpop.permute.xlu0 %275  ;;  %v188_v37 = vpop.permute.xlu1 %187 }
 0x22f   :  { %1789 = vmatpush3.xpose.msk.msra.mxu0 %vm189_vm4, %v188_v37  ;;  %1794 = vmatpush3.msra.mxu1 %v276_v36 }
 0x230   :  { %1798 = vmatprep.subr.mxu1 %v2047_v7  ;;  %1803 = vmatprep.subr.mxu0 %v2047_v7 }
 0x232   :  { %1791 = vmatmul.mubr.msk.f32.vlgmr.msra.gmra.mrb[4].mxu0 %vm189_vm4, %v2171_v32  ;;  %v360_v48 = vpop.permute.xlu0 %359 }
 0x233   :  { %1805 = vmatprep.mubr.msk.f32.mxu0 %vm2048_vm1, %v2047_v7 }
 0x236   :  { %v358_v49 = vpop.permute.xlu0 %357 }
 0x305   :  { %v260_v39 = vpop.f32.mrb[4].mxu0 }
 0x306   :  { %v261_v40 = vadd.f32 %v260_v39, %v2196_v38  ;;  %v1792_v41 = vpop.f32.mrb[5].mxu0 }
 0x308   :  { %v264_v42 = vsel %vm189_vm4, %v261_v40, -inf }
 0x309   :  { %265 = vmax.xlane.f32.xlu1 %v264_v42 }
 0x31a   :  { %535 = vrot.lane.b32.xlu1 %v2171_v32, %s2052_s29 }
 0x31e   :  { %1058 = vrot.lane.b32.xlu1 %v2173_v35, %s2050_s3 }
 0x322   :  { %1232 = vrot.lane.b32.xlu1 %v2173_v35, %s2052_s29 }
 0x326   :  { %1406 = vrot.lane.b32.xlu1 %v2173_v35, %s2053_s30 }
 0x396   :  { %v266_v43 = vpop.xlane.xlu1 %265 }
 0x397   :  { %v267_v44 = vsub.f32 %v261_v40, %v266_v43 }
 0x399   :  { %v268_v45 = vmul.f32 1.442695, %v267_v44 }
 0x39a   :  { %v536_v56 = vpop.permute.xlu1 %535 }
 0x39b   :  { %1910 = vpow2.f32 %v268_v45 }
 0x39e   :  { %v1059_v58 = vpop.permute.xlu1 %1058 }
 0x3a2   :  { %v1233_v60 = vpop.permute.xlu1 %1232 }
 0x3a5   :  { %v1911_v46 = vpop.eup %1910 }
 0x3a6   :  { %v270_v47 = vsel %vm189_vm4, %v1911_v46, 0.0  ;;  %v1407_v62 = vpop.permute.xlu1 %1406 }
 0x3a7   :  { %271 = vadd.xlane.f32.xlu0 %v270_v47 }
 0x3bd   :  { %533 = vrot.lane.b32.xlu0 %v2171_v32, %s2054_s9 }
 0x3c1   :  { %711 = vrot.lane.b32.xlu0 %v2171_v32, %s2053_s30 }
 0x3c5   :  { %709 = vrot.lane.b32.xlu0 %v2171_v32, %s2055_s10 }
 0x3c9   :  { %888 = vrot.lane.b32.xlu0 %v2173_v35, %s2049_s2 }
 0x3cd   :  { %1056 = vrot.lane.b32.xlu0 %v2173_v35, %s2051_s25 }
 0x3d1   :  { %1230 = vrot.lane.b32.xlu0 %v2173_v35, %s2054_s9 }
 0x3d5   :  { %1404 = vrot.lane.b32.xlu0 %v2173_v35, %s2055_s10 }
 0x434   :  { %v272_v50 = vpop.xlane.xlu0 %271 }
 0x435   :  { %1912 = vrcp.f32 %v272_v50 }
 0x438   :  { %v534_v51 = vpop.permute.xlu0 %533 }
 0x43c   :  { %v712_v53 = vpop.permute.xlu0 %711 }
 0x43f   :  { %v1913_v52 = vpop.eup %1912 }
 0x440   :  { %v2218_v54 = vmul.f32 %v1913_v52, %v1911_v46  ;;  %v710_v55 = vpop.permute.xlu0 %709 }
 0x442   :  { %1796 = vmatmul.mubr.msk.f32.vlgmr.msra.gmra.mrb[0].mxu1 %vm189_vm4, %v2218_v54 }
 0x443   :  { %1799 = vmatpush3.xpose.msk.msra.mxu1 %vm189_vm4, %v360_v48  ;;  %1800 = vmatprep.mubr.msk.f32.mxu1 %vm2048_vm1, %v2047_v7 }
 0x444   :  { %1808 = vmatprep.subr.mxu1 %v2047_v7  ;;  %v889_v57 = vpop.permute.xlu0 %888 }
 0x446   :  { %1801 = vmatmul.mubr.msk.f32.vlgmr.msra.gmra.mrb[2].mxu1 %vm189_vm4, %v358_v49 }
 0x447   :  { %1809 = vmatpush3.xpose.msk.msra.mxu1 %vm189_vm4, %v536_v56  ;;  %1810 = vmatprep.mubr.msk.f32.mxu1 %vm2048_vm1, %v2047_v7 }
 0x448   :  { %1818 = vmatprep.subr.mxu1 %v2047_v7  ;;  %v1057_v59 = vpop.permute.xlu0 %1056 }
 0x44a   :  { %1811 = vmatmul.mubr.msk.f32.vlgmr.msra.gmra.mrb[4].mxu1 %vm189_vm4, %v534_v51 }
 0x44b   :  { %1819 = vmatpush3.xpose.msk.msra.mxu1 %vm189_vm4, %v712_v53  ;;  %1820 = vmatprep.mubr.msk.f32.mxu1 %vm2048_vm1, %v2047_v7 }
 0x44c   :  { %1828 = vmatprep.subr.mxu1 %v2047_v7  ;;  %v1231_v61 = vpop.permute.xlu0 %1230 }
 0x44e   :  { %1821 = vmatmul.mubr.msk.f32.vlgmr.msra.gmra.mrb[6].mxu1 %vm189_vm4, %v710_v55 }
 0x44f   :  { %1829 = vmatpush3.xpose.msk.msra.mxu1 %vm189_vm4, %v889_v57  ;;  %1830 = vmatprep.mubr.msk.f32.mxu1 %vm2048_vm1, %v2047_v7 }
 0x450   :  { %1838 = vmatprep.subr.mxu1 %v2047_v7  ;;  %v1405_v63 = vpop.permute.xlu0 %1404 }
 0x452   :  { %1831 = vmatmul.mubr.msk.f32.vlgmr.msra.gmra.mrb[8].mxu1 %vm189_vm4, %v2173_v35 }
 0x453   :  { %1839 = vmatpush3.xpose.msk.msra.mxu1 %vm189_vm4, %v1059_v58  ;;  %1840 = vmatprep.mubr.msk.f32.mxu1 %vm2048_vm1, %v2047_v7 }
 0x454   :  { %1848 = vmatprep.subr.mxu1 %v2047_v7 }
 0x456   :  { %1841 = vmatmul.mubr.msk.f32.vlgmr.msra.gmra.mrb[10].mxu1 %vm189_vm4, %v1057_v59 }
 0x457   :  { %1849 = vmatpush3.xpose.msk.msra.mxu1 %vm189_vm4, %v1233_v60  ;;  %1850 = vmatprep.mubr.msk.f32.mxu1 %vm2048_vm1, %v2047_v7 }
 0x458   :  { %1858 = vmatprep.subr.mxu1 %v2047_v7 }
 0x45a   :  { %1851 = vmatmul.mubr.msk.f32.vlgmr.msra.gmra.mrb[12].mxu1 %vm189_vm4, %v1231_v61 }
 0x45b   :  { %1859 = vmatpush3.xpose.msk.msra.mxu1 %vm189_vm4, %v1407_v62  ;;  %1860 = vmatprep.mubr.msk.f32.mxu1 %vm2048_vm1, %v2047_v7 }
 0x45c   :  { %1868 = vmatprep.subr.bf16.mxu1 %v2047_v7 }
 0x45e   :  { %1861 = vmatmul.mubr.msk.f32.vlgmr.msra.gmra.mrb[14].mxu1 %vm189_vm4, %v1405_v63 }
 0x45f   :  { %1872 = vmatprep.mubr.msk.bf16.mxu1 %vm2048_vm1, %v2047_v7 }
 0x515   :  { %v347_v0 = vpop.f32.mrb[0].mxu1 }
 0x516   :  { %351 = vst.msk [vmem:[#allocation2] sm:$0xff] %vm189_vm4, %v347_v0  ;;  %v1797_v1 = vpop.f32.mrb[1].mxu1 }
 0x519   :  { %v431_v2 = vpop.f32.mrb[2].mxu1 }
 0x51a   :  { %v432_v3 = vadd.f32 %v431_v2, %v2196_v38  ;;  %v1802_v4 = vpop.f32.mrb[3].mxu1 }
 0x51c   :  { %v435_v5 = vsel %vm189_vm4, %v432_v3, -inf }
 0x51d   :  { %436 = vmax.xlane.f32.xlu1 %v435_v5  ;;  %v607_v6 = vpop.f32.mrb[4].mxu1 }
 0x51e   :  { %v608_v8 = vadd.f32 %v607_v6, %v2196_v38  ;;  %v1812_v9 = vpop.f32.mrb[5].mxu1 }
 0x520   :  { %v611_v10 = vsel %vm189_vm4, %v608_v8, -inf }
 0x521   :  { %612 = vmax.xlane.f32.xlu0 %v611_v10  ;;  %v783_v11 = vpop.f32.mrb[6].mxu1 }
 0x522   :  { %v784_v12 = vadd.f32 %v783_v11, %v2196_v38  ;;  %v1822_v13 = vpop.f32.mrb[7].mxu1 }
 0x524   :  { %v787_v15 = vsel %vm189_vm4, %v784_v12, -inf }
 0x525   :  { %788 = vmax.xlane.f32.xlu0 %v787_v15  ;;  %v960_v16 = vpop.f32.mrb[8].mxu1 }
 0x526   :  { %v961_v17 = vadd.f32 %v1722_v14, %v960_v16  ;;  %v1832_v18 = vpop.f32.mrb[9].mxu1 }
 0x528   :  { %v964_v19 = vsel %vm189_vm4, %v961_v17, -inf }
 0x529   :  { %965 = vmax.xlane.f32.xlu0 %v964_v19  ;;  %v1130_v20 = vpop.f32.mrb[10].mxu1 }
 0x52a   :  { %v1131_v21 = vadd.f32 %v1722_v14, %v1130_v20  ;;  %v1842_v22 = vpop.f32.mrb[11].mxu1 }
 0x52c   :  { %v1134_v23 = vsel %vm189_vm4, %v1131_v21, -inf }
 0x52d   :  { %1135 = vmax.xlane.f32.xlu1 %v1134_v23  ;;  %v1304_v24 = vpop.f32.mrb[12].mxu1 }
 0x52e   :  { %v1305_v25 = vadd.f32 %v1722_v14, %v1304_v24  ;;  %v1852_v26 = vpop.f32.mrb[13].mxu1 }
 0x530   :  { %v1308_v27 = vsel %vm189_vm4, %v1305_v25, -inf }
 0x531   :  { %1309 = vmax.xlane.f32.xlu0 %v1308_v27  ;;  %v1478_v28 = vpop.f32.mrb[14].mxu1 }
 0x532   :  { %v1862_v29 = vpop.f32.mrb[15].mxu1  ;;  %v1479_v30 = vadd.f32 %v1722_v14, %v1478_v28 }
 0x534   :  { %v1482_v31 = vsel %vm189_vm4, %v1479_v30, -inf }
 0x53e   :  { %446 = vrot.lane.b32.xlu1 %v2171_v32, %s2056_s7 }
 0x562   :  { %1483 = vmax.xlane.f32.xlu1 %v1482_v31 }
 0x573   :  { %798 = vrot.lane.b32.xlu1 %v2171_v32, %s2057_s13 }
 0x577   :  { %975 = vrot.lane.b32.xlu1 %v2173_v35, %s2041_s15  ;;  %s2058_s15 = smov 48  }
 0x5aa   :  { %v437_v33 = vpop.xlane.xlu1 %436 }
 0x5ab   :  { %v438_v34 = vsub.f32 %v432_v3, %v437_v33 }
 0x5ad   :  { %v439_v36 = vmul.f32 1.442695, %v438_v34 }
 0x5ae   :  { %v613_v37 = vpop.xlane.xlu0 %612 }
 0x5af   :  { %1914 = vpow2.f32 %v439_v36  ;;  %v614_v38 = vsub.f32 %v608_v8, %v613_v37 }
 0x5b1   :  { %v615_v39 = vmul.f32 1.442695, %v614_v38 }
 0x5b2   :  { %v789_v46 = vpop.xlane.xlu0 %788 }
 0x5b3   :  { %1916 = vpow2.f32 %v615_v39  ;;  %v790_v47 = vsub.f32 %v784_v12, %v789_v46 }
 0x5b5   :  { %v791_v50 = vmul.f32 1.442695, %v790_v47 }
 0x5b6   :  { %v966_v48 = vpop.xlane.xlu0 %965 }
 0x5b7   :  { %v967_v49 = vsub.f32 %v961_v17, %v966_v48  ;;  %1918 = vpow2.f32 %v791_v50 }
 0x5b9   :  { %v1915_v40 = vpop.eup %1914  ;;  %v968_v53 = vmul.f32 1.442695, %v967_v49 }
 0x5ba   :  { %v1136_v41 = vpop.xlane.xlu1 %1135  ;;  %v441_v42 = vsel %vm189_vm4, %v1915_v40, 0.0 }
 0x5bb   :  { %442 = vadd.xlane.f32.xlu0 %v441_v42  ;;  %v1137_v51 = vsub.f32 %v1131_v21, %v1136_v41  ;;  %1920 = vpow2.f32 %v968_v53 }
 0x5bd   :  { %v1917_v43 = vpop.eup %1916  ;;  %v1138_v55 = vmul.f32 1.442695, %v1137_v51 }
 0x5be   :  { %v447_v44 = vpop.permute.xlu1 %446  ;;  %v617_v45 = vsel %vm189_vm4, %v1917_v43, 0.0  ;;  %v1310_v52 = vpop.xlane.xlu0 %1309 }
 0x5bf   :  { %618 = vadd.xlane.f32.xlu1 %v617_v45  ;;  %1804 = vmatpush3.msra.mxu0 %v447_v44  ;;  %v1311_v56 = vsub.f32 %v1305_v25, %v1310_v52  ;;  %1922 = vpow2.f32 %v1138_v55 }
 0x5c0   :  { %1813 = vmatprep.subr.mxu0 %v2047_v7 }
 0x5c1   :  { %v1312_v57 = vmul.f32 1.442695, %v1311_v56  ;;  %v1919_v58 = vpop.eup %1918 }
 0x5c3   :  { %1924 = vpow2.f32 %v1312_v57 }
 0x5c5   :  { %v1921_v59 = vpop.eup %1920 }
 0x5c6   :  { %v970_v0 = vsel %vm189_vm4, %v1921_v59, 0.0 }
 0x5c9   :  { %v1923_v61 = vpop.eup %1922 }
 0x5ca   :  { %v1140_v1 = vsel %vm189_vm4, %v1923_v61, 0.0 }
 0x5cd   :  { %v1925_v2 = vpop.eup %1924 }
 0x5ce   :  { %v1314_v3 = vsel %vm189_vm4, %v1925_v2, 0.0 }
 0x5d0   :  { %1145 = vrot.lane.b32.xlu1 %v2173_v35, %s2056_s7 }
 0x5d1   :  { %622 = vrot.lane.b32.xlu0 %v2171_v32, %s2058_s15  ;;  %v793_v32 = vsel %vm189_vm4, %v1919_v58, 0.0 }
 0x5ef   :  { %v1484_v60 = vpop.xlane.xlu1 %1483 }
 0x5f0   :  { %v1485_v62 = vsub.f32 %v1479_v30, %v1484_v60  ;;  %794 = vadd.xlane.f32.xlu0 %v793_v32 }
 0x5f2   :  { %v1486_v63 = vmul.f32 1.442695, %v1485_v62 }
 0x5f3   :  { %v799_v6 = vpop.permute.xlu1 %798 }
 0x5f4   :  { %1926 = vpow2.f32 %v1486_v63  ;;  %971 = vadd.xlane.f32.xlu1 %v970_v0  ;;  %1141 = vadd.xlane.f32.xlu0 %v1140_v1 }
 0x5f7   :  { %v976_v8 = vpop.permute.xlu1 %975 }
 0x5f8   :  { %1315 = vadd.xlane.f32.xlu1 %v1314_v3 }
 0x5fe   :  { %v1927_v4 = vpop.eup %1926 }
 0x5ff   :  { %v1488_v5 = vsel %vm189_vm4, %v1927_v4, 0.0 }
 0x600   :  { %1489 = vadd.xlane.f32.xlu0 %v1488_v5 }
 0x609   :  { %1493 = vrot.lane.b32.xlu1 %v2173_v35, %s2057_s13 }
 0x616   :  { %1319 = vrot.lane.b32.xlu0 %v2173_v35, %s2058_s15 }
 0x648   :  { %v443_v9 = vpop.xlane.xlu0 %442 }
 0x649   :  { %1928 = vrcp.f32 %v443_v9 }
 0x64c   :  { %v619_v10 = vpop.xlane.xlu1 %618  ;;  %v623_v13 = vpop.permute.xlu0 %622 }
 0x64d   :  { %1930 = vrcp.f32 %v619_v10 }
 0x650   :  { %v1146_v35 = vpop.permute.xlu1 %1145 }
 0x653   :  { %v1929_v11 = vpop.eup %1928 }
 0x654   :  { %v2294_v12 = vmul.f32 %v1929_v11, %v1915_v40 }
 0x656   :  { %1806 = vmatmul.mubr.msk.f32.vlgmr.msra.gmra.mrb[6].mxu0 %vm189_vm4, %v2294_v12 }
 0x657   :  { %v1931_v14 = vpop.eup %1930  ;;  %1814 = vmatpush3.msra.mxu0 %v623_v13  ;;  %1815 = vmatprep.mubr.msk.f32.mxu0 %vm2048_vm1, %v2047_v7 }
 0x658   :  { %v2300_v15 = vmul.f32 %v1931_v14, %v1917_v43  ;;  %1823 = vmatprep.subr.mxu0 %v2047_v7 }
 0x65a   :  { %1816 = vmatmul.mubr.msk.f32.vlgmr.msra.gmra.mrb[8].mxu0 %vm189_vm4, %v2300_v15 }
 0x65b   :  { %1824 = vmatpush3.msra.mxu0 %v799_v6  ;;  %1825 = vmatprep.mubr.msk.f32.mxu0 %vm2048_vm1, %v2047_v7 }
 0x65c   :  { %1833 = vmatprep.subr.mxu0 %v2047_v7 }
 0x67d   :  { %v795_v16 = vpop.xlane.xlu0 %794 }
 0x67e   :  { %1932 = vrcp.f32 %v795_v16 }
 0x681   :  { %v972_v17 = vpop.xlane.xlu1 %971  ;;  %v1142_v18 = vpop.xlane.xlu0 %1141 }
 0x682   :  { %1934 = vrcp.f32 %v972_v17 }
 0x683   :  { %1936 = vrcp.f32 %v1142_v18 }
 0x685   :  { %v1316_v19 = vpop.xlane.xlu1 %1315 }
 0x686   :  { %1938 = vrcp.f32 %v1316_v19 }
 0x688   :  { %v1933_v20 = vpop.eup %1932 }
 0x689   :  { %v2308_v21 = vmul.f32 %v1933_v20, %v1919_v58  ;;  %v1494_v31 = vpop.permute.xlu1 %1493  ;;  %v1740_v20 = vld [vmem:[%s2382_s5] ss:$0 sm:$0xff]  ;;  %s2012_s5 = scalar_lea.vmem %s1691_s20, 256 }
 0x68a   :  { %p2013_p10 = scmp.ne.s32.totalorder %s1691_s20, %s2012_s5  ;;  %p2018_p12 = scmp.lt.s32.totalorder %s2012_s5, %s2012_s5 }
 0x68b   :  { %1826 = vmatmul.mubr.msk.f32.vlgmr.msra.gmra.mrb[10].mxu0 %vm189_vm4, %v2308_v21 }
 0x68c   :  { %1834 = vmatpush3.msra.mxu0 %v976_v8  ;;  %1835 = vmatprep.mubr.msk.f32.mxu0 %vm2048_vm1, %v2047_v7  ;;  %v1935_v22 = vpop.eup %1934  ;;  %p2019_p13 = por %p2018_p12, %p2017_p11 }
 0x68d   :  { %v1490_v23 = vpop.xlane.xlu0 %1489  ;;  %1843 = vmatprep.subr.mxu0 %v2047_v7  ;;  %v2315_v24 = vmul.f32 %v1935_v22, %v1921_v59  ;;  %v1937_v25 = vpop.eup %1936 }
 0x68e   :  { %1940 = vrcp.f32 %v1490_v23  ;;  %v2321_v26 = vmul.f32 %v1937_v25, %v1923_v61  ;;  %v1905_v61 = vld [vmem:[#allocation8 + $0x8] sm:$0xff]   ;;  %v1741_v23 = vld [vmem:[%s2383_s6] ss:$0 sm:$0xff]  ;;  %p2020_p0 = pnand %p2019_p13, %p2013_p10 }
 0x68f   :  { %1836 = vmatmul.mubr.msk.f32.vlgmr.msra.gmra.mrb[12].mxu0 %vm189_vm4, %v2315_v24 }
 0x690   :  { %1844 = vmatpush3.msra.mxu0 %v1146_v35  ;;  %1845 = vmatprep.mubr.msk.f32.mxu0 %vm2048_vm1, %v2047_v7  ;;  %v1939_v28 = vpop.eup %1938 }
 0x691   :  { %v1320_v27 = vpop.permute.xlu0 %1319  ;;  %1853 = vmatprep.subr.mxu0 %v2047_v7  ;;  %v1318_v29 = vmul.f32 %v1939_v28, %v1925_v2 }
 0x693   :  { %1846 = vmatmul.mubr.msk.f32.vlgmr.msra.gmra.mrb[14].mxu0 %vm189_vm4, %v2321_v26 }
 0x694   :  { %1854 = vmatpush3.msra.mxu0 %v1320_v27  ;;  %1855 = vmatprep.mubr.msk.f32.mxu0 %vm2048_vm1, %v2047_v7 }
 0x695   :  { %1863 = vmatprep.subr.mxu0 %v2047_v7 }
 0x697   :  { %1856 = vmatmul.mubr.msk.f32.vlgmr.msra.gmra.mrb[16].mxu0 %vm189_vm4, %v1318_v29 }
 0x698   :  { %v1941_v30 = vpop.eup %1940  ;;  %1864 = vmatpush3.msra.mxu0 %v1494_v31  ;;  %1865 = vmatprep.mubr.msk.f32.mxu0 %vm2048_vm1, %v2047_v7 }
 0x699   :  { %v1492_v33 = vmul.f32 %v1941_v30, %v1927_v4 }
 0x69b   :  { %1866 = vmatmul.mubr.msk.f32.vlgmr.msra.gmra.mrb[18].mxu0 %vm189_vm4, %v1492_v33 }
 0x729   :  { %v518_v34 = vpop.f32.mrb[6].mxu0 }
 0x72a   :  { %523 = vrot.lane.b32.xlu0 %v518_v34, %s2045_s28  ;;  %v1807_v36 = vpop.f32.mrb[7].mxu0 }
 0x72d   :  { %v694_v37 = vpop.f32.mrb[8].mxu0 }
 0x72e   :  { %699 = vrot.lane.b32.xlu0 %v694_v37, %s2059_s14  ;;  %v1817_v38 = vpop.f32.mrb[9].mxu0 }
 0x75e   :  { %v870_v39 = vpop.f32.mrb[10].mxu0 }
 0x75f   :  { %875 = vrot.lane.b32.xlu0 %v870_v39, %s2060_s17  ;;  %v1827_v40 = vpop.f32.mrb[11].mxu0 }
 0x762   :  { %v1047_v41 = vpop.f32.mrb[12].mxu0 }
 0x763   :  { %1051 = vst.msk [vmem:[#allocation2 + $0x8] sm:$0xff] %vm189_vm4, %v1047_v41  ;;  %v1837_v42 = vpop.f32.mrb[13].mxu0 }
 0x766   :  { %v1217_v43 = vpop.f32.mrb[14].mxu0 }
 0x767   :  { %1222 = vrot.lane.b32.xlu1 %v1217_v43, %s2045_s28  ;;  %v1847_v44 = vpop.f32.mrb[15].mxu0 }
 0x76a   :  { %v1391_v45 = vpop.f32.mrb[16].mxu0 }
 0x76b   :  { %1396 = vrot.lane.b32.xlu1 %v1391_v45, %s2059_s14  ;;  %v1857_v46 = vpop.f32.mrb[17].mxu0 }
 0x76e   :  { %v1565_v47 = vpop.f32.mrb[18].mxu0 }
 0x76f   :  { %1570 = vrot.lane.b32.xlu1 %v1565_v47, %s2060_s17  ;;  %v1867_v48 = vpop.f32.mrb[19].mxu0 }
 0x79c   :  { %v524_v49 = vpop.permute.xlu0 %523 }
 0x79d   :  { %527 = vst.msk [vmem:[#allocation2] sm:$0xff] %vm526_vm5, %v524_v49 }
 0x7a0   :  { %v700_v50 = vpop.permute.xlu0 %699 }
 0x7a1   :  { %703 = vst.msk [vmem:[#allocation2] sm:$0xff] %vm702_vm6, %v700_v50 }
 0x7d1   :  { %v876_v51 = vpop.permute.xlu0 %875 }
 0x7d2   :  { %879 = vst.msk [vmem:[#allocation2] sm:$0xff] %vm878_vm7, %v876_v51 }
 0x7d9   :  { %v1578_v52 = vld [vmem:[#allocation2] sm:$0xff]  ;;  %v1223_v53 = vpop.permute.xlu1 %1222 }
 0x7da   :  { %v1580_v55 = vand.u32 2147483647, %v1578_v52  ;;  %1225 = vst.msk [vmem:[#allocation2 + $0x8] sm:$0xff] %vm526_vm5, %v1223_v53 }
 0x7dc   :  { %v1582_v56 = vsel %vm76_vm0, %v1580_v55, -inf }
 0x7dd   :  { %1583 = vmax.xlane.f32.xlu0 %v1582_v56  ;;  %v1397_v57 = vpop.permute.xlu1 %1396 }
 0x7de   :  { %1399 = vst.msk [vmem:[#allocation2 + $0x8] sm:$0xff] %vm702_vm6, %v1397_v57 }
 0x7e1   :  { %v1571_v58 = vpop.permute.xlu1 %1570 }
 0x7e2   :  { %1573 = vst.msk [vmem:[#allocation2 + $0x8] sm:$0xff] %vm878_vm7, %v1571_v58 }
 0x7e9   :  { %v1579_v59 = vld [vmem:[#allocation2 + $0x8] sm:$0xff] }
 0x7ea   :  { %v1581_v60 = vand.u32 2147483647, %v1579_v59 }
 0x7ec   :  { %v1585_v32 = vsel %vm76_vm0, %v1581_v60, -inf }
 0x7ed   :  { %1586 = vmax.xlane.f32.xlu1 %v1585_v32 }
 0x7f3   :  { %352 = vrot.lane.b32.xlu0 %v2218_v54, %s2049_s2  ;;  %v1904_v54 = vld [vmem:[#allocation8] sm:$0xff]  }
 0x7f4   :  { %1869 = vmatpush3.bf16.msra.mxu1 %v1904_v54 }
 0x7f5   :  { %1870 = vmatprep.subr.bf16.mxu1 %v2047_v7 }
 0x7f7   :  { %704 = vrot.lane.b32.xlu0 %v2300_v15, %s2054_s9 }
 0x7f8   :  { %1871 = vmatpush3.bf16.msra.mxu1 %v1905_v61 }
 0x7fb   :  { %1052 = vrot.lane.b32.xlu0 %v2315_v24, %s2049_s2 }
 0x7fe   :  { %528 = vrot.lane.b32.xlu1 %v2294_v12, %s2055_s10 }
 0x7ff   :  { %1400 = vrot.lane.b32.xlu0 %v1318_v29, %s2054_s9 }
 0x802   :  { %880 = vrot.lane.b32.xlu1 %v2308_v21, %s2051_s25 }
 0x806   :  { %1226 = vrot.lane.b32.xlu1 %v2321_v26, %s2055_s10 }
 0x80a   :  { %1574 = vrot.lane.b32.xlu1 %v1492_v33, %s2051_s25 }
 0x86a   :  { %v1584_v62 = vpop.xlane.xlu0 %1583 }
 0x86b   :  { %v1588_v0 = vmul.f32 0.007874016, %v1584_v62 }
 0x86d   :  { %v1590_v2 = vmax.f32 %v1588_v0, 1e-05 }
 0x86e   :  { %v353_v63 = vpop.permute.xlu0 %352 }
 0x86f   :  { %356 = vst.msk [vmem:[#allocation9] sm:$0xff] %vm355_vm8, %v353_v63  ;;  %1942 = vrcp.f32 %v1590_v2  ;;  %v1670_v21 = vmul.f32 %v1740_v20, %v1590_v2 }
 0x872   :  { %v705_v1 = vpop.permute.xlu0 %704 }
 0x876   :  { %v1053_v3 = vpop.permute.xlu0 %1052 }
 0x877   :  { %1055 = vst.msk [vmem:[#allocation9 + $0x8] sm:$0xff] %vm355_vm8, %v1053_v3 }
 0x879   :  { %v1943_v9 = vpop.eup %1942 }
 0x87a   :  { %v1587_v4 = vpop.xlane.xlu1 %1586  ;;  %v1594_v10 = vmul.f32 %v1943_v9, %v1578_v52  ;;  %v1401_v12 = vpop.permute.xlu0 %1400 }
 0x87b   :  { %v1589_v5 = vmul.f32 0.007874016, %v1587_v4 }
 0x87c   :  { %v1878_v35 = vround.rtne.f32 %v1594_v10 }
 0x87d   :  { %v1591_v6 = vmax.f32 %v1589_v5, 1e-05 }
 0x87e   :  { %v529_v8 = vpop.permute.xlu1 %528  ;;  %v1735_v17 = vclamps-f32 %v1878_v35, 127.0 }
 0x87f   :  { %1944 = vrcp.f32 %v1591_v6  ;;  %532 = vst.msk [vmem:[#allocation9] sm:$0xff] %vm531_vm9, %v529_v8  ;;  %v1671_v26 = vmul.f32 %v1740_v20, %v1591_v6 }
 0x880   :  { %708 = vst.msk [vmem:[#allocation9] sm:$0xff] %vm707_vm10, %v705_v1 }
 0x882   :  { %v881_v7 = vpop.permute.xlu1 %880 }
 0x883   :  { %884 = vst.msk [vmem:[#allocation9] sm:$0xff] %vm883_vm11, %v881_v7 }
 0x886   :  { %v1227_v11 = vpop.permute.xlu1 %1226 }
 0x887   :  { %1229 = vst.msk [vmem:[#allocation9 + $0x8] sm:$0xff] %vm531_vm9, %v1227_v11 }
 0x888   :  { %1403 = vst.msk [vmem:[#allocation9 + $0x8] sm:$0xff] %vm707_vm10, %v1401_v12 }
 0x889   :  { %v1945_v13 = vpop.eup %1944 }
 0x88a   :  { %v1595_v14 = vmul.f32 %v1945_v13, %v1579_v59  ;;  %v1575_v15 = vpop.permute.xlu1 %1574 }
 0x88b   :  { %1577 = vst.msk [vmem:[#allocation9 + $0x8] sm:$0xff] %vm883_vm11, %v1575_v15 }
 0x88c   :  { %v1879_v16 = vround.rtne.f32 %v1595_v14 }
 0x88e   :  { %v1736_v18 = vclamps-f32 %v1879_v16, 127.0 }
 0x890   :  { %v1602_v19 = vpack.c.bf16 %v1736_v18, %v1735_v17 }
 0x892   :  { %1873 = vmatmul.mubr.msk.bf16.vlgmr.msra.gmra.mrb[16].mxu1 %vm76_vm0, %v1602_v19 }
 0x965   :  { %v1656_v22 = vpop.f32.mrb[16].mxu1 }
 0x966   :  { %v1672_v24 = vmul.f32 %v1670_v21, %v1656_v22  ;;  %v1874_v25 = vpop.f32.mrb[17].mxu1 }
 0x967   :  { %v1659_v27 = vpop.f32.mrb[18].mxu1 }
 0x968   :  { %v1681_v28 = vadd.f32 %v1741_v23, %v1672_v24  ;;  %v1673_v29 = vmul.f32 %v1671_v26, %v1659_v27  ;;  %v1875_v30 = vpop.f32.mrb[19].mxu1 }
 0x96a   :  { %1683 = vst.msk [vmem:[#allocation9] sm:$0xff] %vm76_vm0, %v1681_v28  ;;  %v1682_v31 = vadd.f32 %v1741_v23, %v1673_v29 }
 0x96c   :  { %1684 = vst.msk [vmem:[#allocation9 + $0x8] sm:$0xff] %vm76_vm0, %v1682_v31 }
 0x96d   :  { %2023 = shalt.err (!%p2020_p0)
}
 0x96e   :  { %s2024_s16 = scalar_lea.hbm %s2385_s8, 256 }
 0x96f   :  { %p2025_p1 = scmp.ne.s32.totalorder %s2385_s8, %s2024_s16  ;;  %p2028_p2 = scmp.lt.u32.totalorder %s2024_s16, %s2385_s8 }
 0x971   :  { %p2030_p3 = pnand %p2028_p2, %p2025_p1 }
 0x973   :  { %2033 = shalt.err (!%p2030_p3)
}
 0x974   :  { %1696 = dma.vmem_to_hbm [thread:$0]  %s1691_s20, 256, %s2385_s8, [#allocation5], %s2044_s1, %s2044_s1, %s2045_s28  }
 0x975   :  { %2038 = dma.done.wait [#allocation5], 256  }
 0x976   :  { %2039 = vsyncadd [#allocation5], 4294967040 }
 0x977   :  { %1700 = vsyncpa [#allocation4], 1 }
 0x978   :  { %1701 = vsyncpa [#allocation7], 1 }
 0x979   :  { %1702 = vsyncpa [#allocation5], 1 }

</bundles_post_ra>
